<compile_context>
chip_gen: v7x
topology: tpu7x:2x2x1
jax: 0.10.0
libtpu: 0.0.40
codegen_flags: <defaults>
</compile_context>

<pallas_src>
import math
import functools

import jax
import jax.numpy as jnp
from jax import lax
from jax.experimental import pallas as pl
from jax.experimental.pallas import tpu as pltpu


# ---------------------------------------------------------------------------
# Kernel: one block of `bt` batch elements per grid step.
# ---------------------------------------------------------------------------
def _mha_memory_kernel(*refs, bt, nq, nk, h, d_k, d_v, m, eps, compute_dtype,
                       fuse_kv, approx_recip):
    if fuse_kv:
        (q_ref, kv_ref,
         wq_ref, bq_ref, wkv_ref, bkv_ref, wo_ref, bo_ref,
         mk_ref, mv_ref, gamma_ref, beta_ref,
         out_ref, attn_scr) = refs
    else:
        (q_ref, k_ref, v_ref,
         wq_ref, bq_ref, wk_ref, bk_ref, wv_ref, bv_ref, wo_ref, bo_ref,
         mk_ref, mv_ref, gamma_ref, beta_ref,
         out_ref, attn_scr) = refs

    f32 = jnp.float32
    cdt = compute_dtype
    d_model = q_ref.shape[-1]
    rows_q = bt * nq
    rows_k = bt * nk
    hdk = h * d_k

    # ---- projections: batch folded into the matmul M dimension ----
    # queries stay f32 in HBM (needed for the residual); cast once for the MXU.
    q_in = q_ref[...].reshape(rows_q, d_model)
    q_proj = jnp.dot(q_in.astype(cdt), wq_ref[...], preferred_element_type=f32) + bq_ref[...]
    q_proj = (q_proj * (1.0 / math.sqrt(d_k))).astype(cdt)      # fold 1/sqrt(d_k) into Q once

    if fuse_kv:
        # keys is values: single N = h*(d_k+d_v) projection, split by static lane slice.
        kv_in = kv_ref[...].reshape(rows_k, d_model)             # already compute_dtype
        kv_proj = (jnp.dot(kv_in, wkv_ref[...], preferred_element_type=f32)
                   + bkv_ref[...]).astype(cdt)
        k_proj = kv_proj[:, :hdk]
        v_proj = kv_proj[:, hdk:]
    else:
        k_in = k_ref[...].reshape(rows_k, d_model)               # already compute_dtype
        v_in = v_ref[...].reshape(rows_k, d_model)
        k_proj = (jnp.dot(k_in, wk_ref[...], preferred_element_type=f32)
                  + bk_ref[...]).astype(cdt)
        v_proj = (jnp.dot(v_in, wv_ref[...], preferred_element_type=f32)
                  + bv_ref[...]).astype(cdt)

    mk = mk_ref[...]          # (m, h*d_k): already sqrt(d_k)*m_k (q carries the 1/sqrt(d_k))
    mv = mv_ref[...]          # (m, h*d_v): already sqrt(m)*m_v

    dn_nt = (((1,), (1,)), ((), ()))    # contract last axes: A @ B.T without a transpose

    def head_out(head, q_p, k_p, v_p):
        kc = slice(head * d_k, (head + 1) * d_k)
        vc = slice(head * d_v, (head + 1) * d_v)
        qh, kh, vh = q_p[:, kc], k_p[:, kc], v_p[:, vc]
        mkh, mvh = mk[:, kc], mv[:, vc]
        # logits against real keys and against memory slots kept separate (no K/V concat)
        s_k = lax.dot_general(qh, kh, dn_nt, preferred_element_type=f32)     # (nq, nk)
        s_m = lax.dot_general(qh, mkh, dn_nt, preferred_element_type=f32)    # (nq, m)
        # TODO(synk): attention_mask / attention_weights are None in this config; a mask
        # would be a jnp.where applied to s_k only (memory columns are never masked).
        row_max = jnp.maximum(jnp.max(s_k, axis=-1, keepdims=True),
                              jnp.max(s_m, axis=-1, keepdims=True))
        p_k = jnp.exp(s_k - row_max)
        p_m = jnp.exp(s_m - row_max)
        denom = (jnp.sum(p_k, axis=-1, keepdims=True)
                 + jnp.sum(p_m, axis=-1, keepdims=True))
        inv = pl.reciprocal(denom, approx=True) if approx_recip else 1.0 / denom
        p_k = (p_k * inv).astype(cdt)
        p_m = (p_m * inv).astype(cdt)
        return (jnp.dot(p_k, vh, preferred_element_type=f32)
                + jnp.dot(p_m, mvh, preferred_element_type=f32))             # (nq, d_v) f32

    # bt and h are small static ints -> loops unroll. Keep bt small (<= 2 recommended,
    # pushing batch into the grid) so vreg live ranges stay bounded.
    for bb in range(bt):
        q_rows = slice(bb * nq, (bb + 1) * nq)
        k_rows = slice(bb * nk, (bb + 1) * nk)
        q_p = q_proj[q_rows, :]
        k_p = k_proj[k_rows, :]
        v_p = v_proj[k_rows, :]
        # heads in pairs -> one 2*d_v-wide store per pair (128 lanes for d_v = 64)
        for head in range(0, h - 1, 2):
            o0 = head_out(head, q_p, k_p, v_p)
            o1 = head_out(head + 1, q_p, k_p, v_p)
            attn_scr[q_rows, head * d_v:(head + 2) * d_v] = (
                jnp.concatenate([o0, o1], axis=-1).astype(cdt))
        if h % 2:
            head = h - 1
            attn_scr[q_rows, head * d_v:(head + 1) * d_v] = (
                head_out(head, q_p, k_p, v_p).astype(cdt))

    # ---- output projection over the whole block (single K = h*d_v dot, M = bt*nq) ----
    o = jnp.dot(attn_scr[...], wo_ref[...], preferred_element_type=f32) + bo_ref[...]

    # ---- dropout = identity (inference), residual, LayerNorm (all f32) ----
    res = q_ref[...].reshape(rows_q, d_model) + o      # re-read queries (f32) for the residual
    mean = jnp.mean(res, axis=-1, keepdims=True)
    cen = res - mean
    var = jnp.mean(cen * cen, axis=-1, keepdims=True)
    y = cen * lax.rsqrt(var + eps) * gamma_ref[...] + beta_ref[...]
    out_ref[...] = y.reshape(bt, nq, d_model).astype(out_ref.dtype)


# ---------------------------------------------------------------------------
# Wrapper
# ---------------------------------------------------------------------------
def multihead_attention_memory(queries, keys, values, params, *, h, d_k, d_v, m,
                               eps=1e-5, batch_tile=1, compute_dtype=jnp.bfloat16,
                               out_dtype=None, approx_reciprocal=True,
                               vmem_limit_bytes=None):
    b, nq, d_model = queries.shape
    nk = keys.shape[1]
    assert b % batch_tile == 0, "batch must be divisible by batch_tile"
    bt = batch_tile
    cdt = jnp.dtype(compute_dtype)
    out_dtype = queries.dtype if out_dtype is None else jnp.dtype(out_dtype)
    fuse_kv = keys is values       # self-attention call -> fuse Wk/Wv into one projection

    # Grid-invariant prep done once here (not per grid step):
    #   * weights cast to the MXU compute dtype, K/V inputs pre-cast too
    #   * memory slots pre-scaled by sqrt(d_k) / sqrt(m) and pre-cast
    wq = params["wq"].astype(cdt)
    bq = params["bq"].astype(jnp.float32)
    wo = params["wo"].astype(cdt)
    bo = params["bo"].astype(jnp.float32)
    mk = (math.sqrt(d_k) * params["m_k"]).astype(cdt)        # (m, h*d_k)
    mv = (math.sqrt(m) * params["m_v"]).astype(cdt)          # (m, h*d_v)
    gamma = params["gamma"].astype(jnp.float32)
    beta = params["beta"].astype(jnp.float32)
    keys_c = keys.astype(cdt)
    if fuse_kv:
        wkv = jnp.concatenate([params["wk"], params["wv"]], axis=1).astype(cdt)
        bkv = jnp.concatenate([params["bk"], params["bv"]], axis=1).astype(jnp.float32)
        weight_args = (wq, bq, wkv, bkv, wo, bo, mk, mv, gamma, beta)
        seq_args = (queries, keys_c)
    else:
        wk = params["wk"].astype(cdt)
        bk = params["bk"].astype(jnp.float32)
        wv = params["wv"].astype(cdt)
        bv = params["bv"].astype(jnp.float32)
        values_c = values.astype(cdt)
        weight_args = (wq, bq, wk, bk, wv, bv, wo, bo, mk, mv, gamma, beta)
        seq_args = (queries, keys_c, values_c)

    kernel = functools.partial(
        _mha_memory_kernel, bt=bt, nq=nq, nk=nk, h=h, d_k=d_k, d_v=d_v, m=m,
        eps=eps, compute_dtype=cdt, fuse_kv=fuse_kv, approx_recip=approx_reciprocal)

    def const_spec(arr):
        n = arr.ndim
        # grid-invariant operand: fetched once, single buffer (frees the second VMEM copy)
        return pl.BlockSpec(arr.shape, lambda i, n=n: (0,) * n,
                            pipeline_mode=pl.Buffered(1))

    seq_specs = [pl.BlockSpec((bt, nq, d_model), lambda i: (i, 0, 0))]
    seq_specs += [pl.BlockSpec((bt, nk, d_model), lambda i: (i, 0, 0))
                  for _ in range(len(seq_args) - 1)]
    in_specs = seq_specs + [const_spec(a) for a in weight_args]

    if vmem_limit_bytes is None:
        # Rough per-step footprint: pipelined I/O blocks + single-buffered weights +
        # attn scratch + f32/cdt projection temporaries, with headroom. Clamped to a
        # range valid on v5e/v6e (128 MiB VMEM) and v7x (64 MiB VMEM).
        cdt_sz = cdt.itemsize
        out_sz = out_dtype.itemsize
        dkv = h * (d_k + d_v)
        est = bt * nq * d_model * 4 * 2                               # Q blocks (x2 buffers)
        est += bt * nk * d_model * cdt_sz * 2 * (len(seq_args) - 1)   # K(,V) blocks
        est += bt * nq * d_model * out_sz * 2                         # output blocks
        est += d_model * (h * d_k + dkv) * cdt_sz                     # wq + wk/wv (or wkv)
        est += (h * d_v) * d_model * cdt_sz + m * dkv * cdt_sz        # wo + memory slots
        est += 16 * max(d_model, h * max(d_k, d_v)) * 4               # biases + gamma/beta
        est += bt * nq * h * d_v * cdt_sz                             # attn scratch
        est += bt * nq * h * d_k * (4 + cdt_sz)                       # q_proj (f32 + cdt)
        est += bt * nk * dkv * (4 + cdt_sz)                           # k/v_proj (f32 + cdt)
        est += bt * nq * d_model * 4 * 3                              # o / res / y temporaries
        vmem_limit_bytes = int(max(32 << 20, min(int(est * 1.5) + (2 << 20), 64 << 20)))

    return pl.pallas_call(
        kernel,
        out_shape=jax.ShapeDtypeStruct((b, nq, d_model), out_dtype),
        grid_spec=pltpu.PrefetchScalarGridSpec(
            num_scalar_prefetch=0,
            grid=(b // bt,),
            in_specs=in_specs,
            out_specs=pl.BlockSpec((bt, nq, d_model), lambda i: (i, 0, 0)),
            scratch_shapes=[pltpu.VMEM((bt * nq, h * d_v), cdt)],
        ),
        compiler_params=pltpu.CompilerParams(
            dimension_semantics=("parallel",),
            vmem_limit_bytes=vmem_limit_bytes),
    )(*seq_args, *weight_args)


# ---------------------------------------------------------------------------
# Deterministic parameter init mirroring the PyTorch module's init_weights()
# ---------------------------------------------------------------------------
def init_params(key, d_model, d_k, d_v, h, m):
    def xavier(key, fan_in, fan_out):
        bound = math.sqrt(6.0 / (fan_in + fan_out))
        return jax.random.uniform(key, (fan_in, fan_out), jnp.float32, -bound, bound)

    ks = jax.random.split(key, 6)
    return {
        "wq": xavier(ks[0], d_model, h * d_k), "bq": jnp.zeros((1, h * d_k), jnp.float32),
        "wk": xavier(ks[1], d_model, h * d_k), "bk": jnp.zeros((1, h * d_k), jnp.float32),
        "wv": xavier(ks[2], d_model, h * d_v), "bv": jnp.zeros((1, h * d_v), jnp.float32),
        "wo": xavier(ks[3], h * d_v, d_model), "bo": jnp.zeros((1, d_model), jnp.float32),
        "m_k": (1.0 / d_k) * jax.random.normal(ks[4], (m, h * d_k), jnp.float32),
        "m_v": (1.0 / m) * jax.random.normal(ks[5], (m, h * d_v), jnp.float32),
        "gamma": jnp.ones((1, d_model), jnp.float32),
        "beta": jnp.zeros((1, d_model), jnp.float32),
    }


# ---------------------------------------------------------------------------
# Pure-JAX reference (same math as the PyTorch module, eval mode)
# ---------------------------------------------------------------------------
def reference(queries, keys, values, p, *, h, d_k, d_v, m, eps=1e-5):
    b, nq, d_model = queries.shape
    nk = keys.shape[1]
    q = (queries @ p["wq"] + p["bq"]).reshape(b, nq, h, d_k).transpose(0, 2, 1, 3)
    k = jnp.concatenate(
        [keys @ p["wk"] + p["bk"], math.sqrt(d_k) * jnp.broadcast_to(p["m_k"], (b, m, h * d_k))],
        axis=1).reshape(b, nk + m, h, d_k).transpose(0, 2, 3, 1)
    v = jnp.concatenate(
        [values @ p["wv"] + p["bv"], math.sqrt(m) * jnp.broadcast_to(p["m_v"], (b, m, h * d_v))],
        axis=1).reshape(b, nk + m, h, d_v).transpose(0, 2, 1, 3)
    att = jax.nn.softmax(jnp.einsum("bhqd,bhdk->bhqk", q, k) / math.sqrt(d_k), axis=-1)
    out = jnp.einsum("bhqk,bhkd->bhqd", att, v).transpose(0, 2, 1, 3).reshape(b, nq, h * d_v)
    out = out @ p["wo"] + p["bo"]
    res = queries + out
    mean = jnp.mean(res, axis=-1, keepdims=True)
    var = jnp.mean((res - mean) ** 2, axis=-1, keepdims=True)
    return (res - mean) * jax.lax.rsqrt(var + eps) * p["gamma"] + p["beta"]


if __name__ == "__main__":
    # Small config consistent with the module: d_model = h * d_k
    B, NQ, NK = 2, 8, 8
    D_MODEL, H, D_K, D_V, M = 32, 4, 8, 8, 8

    key = jax.random.PRNGKey(0)
    kq, kk, kv, kp, kp2 = jax.random.split(key, 5)
    queries = jax.random.normal(kq, (B, NQ, D_MODEL), jnp.float32)
    keys = jax.random.normal(kk, (B, NK, D_MODEL), jnp.float32)
    values = jax.random.normal(kv, (B, NK, D_MODEL), jnp.float32)

    params = init_params(kp, D_MODEL, D_K, D_V, H, M)
    ref = reference(queries, keys, values, params, h=H, d_k=D_K, d_v=D_V, m=M)

    # f32 MXU path, exact softmax reciprocal, batch_tile=1 -> 2 grid steps
    out_f32 = multihead_attention_memory(
        queries, keys, values, params, h=H, d_k=D_K, d_v=D_V, m=M,
        batch_tile=1, compute_dtype=jnp.float32, approx_reciprocal=False)
    out_f32 = jax.block_until_ready(out_f32)
    assert out_f32.shape == (B, NQ, D_MODEL)
    assert jnp.allclose(out_f32, ref, atol=1e-2, rtol=1e-2), "f32 kernel mismatch vs reference"

    # bf16 MXU path (recommended on v6e/v7x): softmax/LayerNorm still f32, bf16 writeback
    out_bf16 = multihead_attention_memory(
        queries, keys, values, params, h=H, d_k=D_K, d_v=D_V, m=M,
        batch_tile=1, compute_dtype=jnp.bfloat16, out_dtype=jnp.bfloat16)
    out_bf16 = jax.block_until_ready(out_bf16)
    assert jnp.allclose(out_bf16.astype(jnp.float32), ref, atol=1e-1, rtol=1e-1), \
        "bf16 kernel mismatch vs reference"

    # Self-attention call (keys is values): exercises the fused Wk/Wv projection and
    # the whole batch folded into one grid step (batch folded into matmul M dimension)
    ref_self = reference(queries, queries, queries, params, h=H, d_k=D_K, d_v=D_V, m=M)
    out_self = multihead_attention_memory(
        queries, queries, queries, params, h=H, d_k=D_K, d_v=D_V, m=M,
        batch_tile=2, compute_dtype=jnp.float32, approx_reciprocal=False)
    out_self = jax.block_until_ready(out_self)
    assert jnp.allclose(out_self, ref_self, atol=1e-2, rtol=1e-2), "fused-KV kernel mismatch"

    # Odd head count: exercises the leftover single-head store path
    H3 = 3
    params3 = init_params(kp2, D_MODEL, D_K, D_V, H3, M)
    ref3 = reference(queries, keys, values, params3, h=H3, d_k=D_K, d_v=D_V, m=M)
    out3 = multihead_attention_memory(
        queries, keys, values, params3, h=H3, d_k=D_K, d_v=D_V, m=M,
        batch_tile=1, compute_dtype=jnp.float32, approx_reciprocal=False)
    out3 = jax.block_until_ready(out3)
    assert jnp.allclose(out3, ref3, atol=1e-2, rtol=1e-2), "odd-head kernel mismatch"

    print("KERNEL_OK")
</pallas_src>

<mosaic_0001>
module attributes {stable_mosaic.version = 11 : i64} {
  func.func @_mha_memory_kernel(%arg0: i32, %arg1: memref<1x8x32xf32, #tpu.memory_space<vmem>>, %arg2: memref<1x8x32xf32, #tpu.memory_space<vmem>>, %arg3: memref<1x8x32xf32, #tpu.memory_space<vmem>>, %arg4: memref<32x32xf32, #tpu.memory_space<vmem>>, %arg5: memref<1x32xf32, #tpu.memory_space<vmem>>, %arg6: memref<32x32xf32, #tpu.memory_space<vmem>>, %arg7: memref<1x32xf32, #tpu.memory_space<vmem>>, %arg8: memref<32x32xf32, #tpu.memory_space<vmem>>, %arg9: memref<1x32xf32, #tpu.memory_space<vmem>>, %arg10: memref<32x32xf32, #tpu.memory_space<vmem>>, %arg11: memref<1x32xf32, #tpu.memory_space<vmem>>, %arg12: memref<8x32xf32, #tpu.memory_space<vmem>>, %arg13: memref<8x32xf32, #tpu.memory_space<vmem>>, %arg14: memref<1x32xf32, #tpu.memory_space<vmem>>, %arg15: memref<1x32xf32, #tpu.memory_space<vmem>>, %arg16: memref<1x8x32xf32, #tpu.memory_space<vmem>>, %arg17: memref<8x32xf32, #tpu.memory_space<vmem>>) attributes {dimension_semantics = [#tpu.dimension_semantics<parallel>], iteration_bounds = array<i64: 2>, scalar_prefetch = 0 : i64, scratch_operands = 1 : i64, tpu.core_type = #tpu.core_type<tc>, window_params = [{transform_indices = @transform_0, window_bounds = array<i64: 1, 8, 32>}, {transform_indices = @transform_1, window_bounds = array<i64: 1, 8, 32>}, {transform_indices = @transform_2, window_bounds = array<i64: 1, 8, 32>}, {pipeline_mode = #tpu.pipeline_mode<synchronous>, transform_indices = @transform_3, window_bounds = array<i64: 32, 32>}, {pipeline_mode = #tpu.pipeline_mode<synchronous>, transform_indices = @transform_4, window_bounds = array<i64: 1, 32>}, {pipeline_mode = #tpu.pipeline_mode<synchronous>, transform_indices = @transform_5, window_bounds = array<i64: 32, 32>}, {pipeline_mode = #tpu.pipeline_mode<synchronous>, transform_indices = @transform_6, window_bounds = array<i64: 1, 32>}, {pipeline_mode = #tpu.pipeline_mode<synchronous>, transform_indices = @transform_7, window_bounds = array<i64: 32, 32>}, {pipeline_mode = #tpu.pipeline_mode<synchronous>, transform_indices = @transform_8, window_bounds = array<i64: 1, 32>}, {pipeline_mode = #tpu.pipeline_mode<synchronous>, transform_indices = @transform_9, window_bounds = array<i64: 32, 32>}, {pipeline_mode = #tpu.pipeline_mode<synchronous>, transform_indices = @transform_10, window_bounds = array<i64: 1, 32>}, {pipeline_mode = #tpu.pipeline_mode<synchronous>, transform_indices = @transform_11, window_bounds = array<i64: 8, 32>}, {pipeline_mode = #tpu.pipeline_mode<synchronous>, transform_indices = @transform_12, window_bounds = array<i64: 8, 32>}, {pipeline_mode = #tpu.pipeline_mode<synchronous>, transform_indices = @transform_13, window_bounds = array<i64: 1, 32>}, {pipeline_mode = #tpu.pipeline_mode<synchronous>, transform_indices = @transform_14, window_bounds = array<i64: 1, 32>}, {transform_indices = @transform_15, window_bounds = array<i64: 1, 8, 32>}]} {
    %c0 = arith.constant 0 : index
    %c0_0 = arith.constant 0 : index
    %c0_1 = arith.constant 0 : index
    %0 = vector.load %arg1[%c0, %c0_0, %c0_1] : memref<1x8x32xf32, #tpu.memory_space<vmem>>, vector<1x8x32xf32>
    %1 = vector.shape_cast %0 : vector<1x8x32xf32> to vector<8x32xf32>
    %c0_2 = arith.constant 0 : index
    %c0_3 = arith.constant 0 : index
    %2 = vector.load %arg4[%c0_2, %c0_3] : memref<32x32xf32, #tpu.memory_space<vmem>>, vector<32x32xf32>
    %cst = arith.constant dense<0.000000e+00> : vector<8x32xf32>
    %3 = tpu.matmul %1, %2, %cst {dimension_numbers = #tpu.dot_dimension_numbers<[1], [0], [0], [1], [0, 0, 1, 1], [], []>} : vector<8x32xf32>, vector<32x32xf32>, vector<8x32xf32> -> vector<8x32xf32>
    %c0_4 = arith.constant 0 : index
    %c0_5 = arith.constant 0 : index
    %4 = vector.load %arg5[%c0_4, %c0_5] : memref<1x32xf32, #tpu.memory_space<vmem>>, vector<1x32xf32>
    %5 = vector.broadcast %4 : vector<1x32xf32> to vector<8x32xf32>
    %6 = arith.addf %3, %5 : vector<8x32xf32>
    %cst_6 = arith.constant 0.353553385 : f32
    %7 = vector.broadcast %cst_6 : f32 to vector<8x32xf32>
    %8 = arith.mulf %6, %7 : vector<8x32xf32>
    %c0_7 = arith.constant 0 : index
    %c0_8 = arith.constant 0 : index
    %c0_9 = arith.constant 0 : index
    %9 = vector.load %arg2[%c0_7, %c0_8, %c0_9] : memref<1x8x32xf32, #tpu.memory_space<vmem>>, vector<1x8x32xf32>
    %10 = vector.shape_cast %9 : vector<1x8x32xf32> to vector<8x32xf32>
    %c0_10 = arith.constant 0 : index
    %c0_11 = arith.constant 0 : index
    %c0_12 = arith.constant 0 : index
    %11 = vector.load %arg3[%c0_10, %c0_11, %c0_12] : memref<1x8x32xf32, #tpu.memory_space<vmem>>, vector<1x8x32xf32>
    %12 = vector.shape_cast %11 : vector<1x8x32xf32> to vector<8x32xf32>
    %c0_13 = arith.constant 0 : index
    %c0_14 = arith.constant 0 : index
    %13 = vector.load %arg6[%c0_13, %c0_14] : memref<32x32xf32, #tpu.memory_space<vmem>>, vector<32x32xf32>
    %cst_15 = arith.constant dense<0.000000e+00> : vector<8x32xf32>
    %14 = tpu.matmul %10, %13, %cst_15 {dimension_numbers = #tpu.dot_dimension_numbers<[1], [0], [0], [1], [0, 0, 1, 1], [], []>} : vector<8x32xf32>, vector<32x32xf32>, vector<8x32xf32> -> vector<8x32xf32>
    %c0_16 = arith.constant 0 : index
    %c0_17 = arith.constant 0 : index
    %15 = vector.load %arg7[%c0_16, %c0_17] : memref<1x32xf32, #tpu.memory_space<vmem>>, vector<1x32xf32>
    %16 = vector.broadcast %15 : vector<1x32xf32> to vector<8x32xf32>
    %17 = arith.addf %14, %16 : vector<8x32xf32>
    %c0_18 = arith.constant 0 : index
    %c0_19 = arith.constant 0 : index
    %18 = vector.load %arg8[%c0_18, %c0_19] : memref<32x32xf32, #tpu.memory_space<vmem>>, vector<32x32xf32>
    %cst_20 = arith.constant dense<0.000000e+00> : vector<8x32xf32>
    %19 = tpu.matmul %12, %18, %cst_20 {dimension_numbers = #tpu.dot_dimension_numbers<[1], [0], [0], [1], [0, 0, 1, 1], [], []>} : vector<8x32xf32>, vector<32x32xf32>, vector<8x32xf32> -> vector<8x32xf32>
    %c0_21 = arith.constant 0 : index
    %c0_22 = arith.constant 0 : index
    %20 = vector.load %arg9[%c0_21, %c0_22] : memref<1x32xf32, #tpu.memory_space<vmem>>, vector<1x32xf32>
    %21 = vector.broadcast %20 : vector<1x32xf32> to vector<8x32xf32>
    %22 = arith.addf %19, %21 : vector<8x32xf32>
    %c0_23 = arith.constant 0 : index
    %c0_24 = arith.constant 0 : index
    %23 = vector.load %arg12[%c0_23, %c0_24] : memref<8x32xf32, #tpu.memory_space<vmem>>, vector<8x32xf32>
    %c0_25 = arith.constant 0 : index
    %c0_26 = arith.constant 0 : index
    %24 = vector.load %arg13[%c0_25, %c0_26] : memref<8x32xf32, #tpu.memory_space<vmem>>, vector<8x32xf32>
    %25 = vector.extract_strided_slice %8 {offsets = [0, 0], sizes = [8, 8], strides = [1, 1]} : vector<8x32xf32> to vector<8x8xf32>
    %26 = vector.extract_strided_slice %17 {offsets = [0, 0], sizes = [8, 8], strides = [1, 1]} : vector<8x32xf32> to vector<8x8xf32>
    %27 = vector.extract_strided_slice %22 {offsets = [0, 0], sizes = [8, 8], strides = [1, 1]} : vector<8x32xf32> to vector<8x8xf32>
    %28 = vector.extract_strided_slice %23 {offsets = [0, 0], sizes = [8, 8], strides = [1, 1]} : vector<8x32xf32> to vector<8x8xf32>
    %29 = vector.extract_strided_slice %24 {offsets = [0, 0], sizes = [8, 8], strides = [1, 1]} : vector<8x32xf32> to vector<8x8xf32>
    %cst_27 = arith.constant dense<0.000000e+00> : vector<8x8xf32>
    %30 = tpu.matmul %25, %26, %cst_27 {dimension_numbers = #tpu.dot_dimension_numbers<[1], [1], [0], [0], [0, 0, 1, 0], [], []>} : vector<8x8xf32>, vector<8x8xf32>, vector<8x8xf32> -> vector<8x8xf32>
    %cst_28 = arith.constant dense<0.000000e+00> : vector<8x8xf32>
    %31 = tpu.matmul %25, %28, %cst_28 {dimension_numbers = #tpu.dot_dimension_numbers<[1], [1], [0], [0], [0, 0, 1, 0], [], []>} : vector<8x8xf32>, vector<8x8xf32>, vector<8x8xf32> -> vector<8x8xf32>
    %cst_29 = arith.constant dense<0xFF800000> : vector<8xf32>
    %32 = vector.multi_reduction <maximumf>, %30, %cst_29 [1] : vector<8x8xf32> to vector<8xf32>
    %33 = vector.shape_cast %32 : vector<8xf32> to vector<8x1xf32>
    %cst_30 = arith.constant dense<0xFF800000> : vector<8xf32>
    %34 = vector.multi_reduction <maximumf>, %31, %cst_30 [1] : vector<8x8xf32> to vector<8xf32>
    %35 = vector.shape_cast %34 : vector<8xf32> to vector<8x1xf32>
    %36 = arith.maximumf %33, %35 : vector<8x1xf32>
    %37 = vector.broadcast %36 : vector<8x1xf32> to vector<8x8xf32>
    %38 = arith.subf %30, %37 : vector<8x8xf32>
    %39 = math.exp %38 : vector<8x8xf32>
    %40 = vector.broadcast %36 : vector<8x1xf32> to vector<8x8xf32>
    %41 = arith.subf %31, %40 : vector<8x8xf32>
    %42 = math.exp %41 : vector<8x8xf32>
    %cst_31 = arith.constant dense<0.000000e+00> : vector<8xf32>
    %43 = vector.multi_reduction <add>, %39, %cst_31 [1] : vector<8x8xf32> to vector<8xf32>
    %44 = vector.shape_cast %43 : vector<8xf32> to vector<8x1xf32>
    %cst_32 = arith.constant dense<0.000000e+00> : vector<8xf32>
    %45 = vector.multi_reduction <add>, %42, %cst_32 [1] : vector<8x8xf32> to vector<8xf32>
    %46 = vector.shape_cast %45 : vector<8xf32> to vector<8x1xf32>
    %47 = arith.addf %44, %46 : vector<8x1xf32>
    %cst_33 = arith.constant 1.000000e+00 : f32
    %48 = vector.broadcast %cst_33 : f32 to vector<8x1xf32>
    %49 = arith.divf %48, %47 : vector<8x1xf32>
    %50 = vector.broadcast %49 : vector<8x1xf32> to vector<8x8xf32>
    %51 = arith.mulf %39, %50 : vector<8x8xf32>
    %52 = vector.broadcast %49 : vector<8x1xf32> to vector<8x8xf32>
    %53 = arith.mulf %42, %52 : vector<8x8xf32>
    %cst_34 = arith.constant dense<0.000000e+00> : vector<8x8xf32>
    %54 = tpu.matmul %51, %27, %cst_34 {dimension_numbers = #tpu.dot_dimension_numbers<[1], [0], [0], [1], [0, 0, 1, 1], [], []>} : vector<8x8xf32>, vector<8x8xf32>, vector<8x8xf32> -> vector<8x8xf32>
    %cst_35 = arith.constant dense<0.000000e+00> : vector<8x8xf32>
    %55 = tpu.matmul %53, %29, %cst_35 {dimension_numbers = #tpu.dot_dimension_numbers<[1], [0], [0], [1], [0, 0, 1, 1], [], []>} : vector<8x8xf32>, vector<8x8xf32>, vector<8x8xf32> -> vector<8x8xf32>
    %56 = arith.addf %54, %55 : vector<8x8xf32>
    %57 = vector.extract_strided_slice %8 {offsets = [0, 8], sizes = [8, 8], strides = [1, 1]} : vector<8x32xf32> to vector<8x8xf32>
    %58 = vector.extract_strided_slice %17 {offsets = [0, 8], sizes = [8, 8], strides = [1, 1]} : vector<8x32xf32> to vector<8x8xf32>
    %59 = vector.extract_strided_slice %22 {offsets = [0, 8], sizes = [8, 8], strides = [1, 1]} : vector<8x32xf32> to vector<8x8xf32>
    %60 = vector.extract_strided_slice %23 {offsets = [0, 8], sizes = [8, 8], strides = [1, 1]} : vector<8x32xf32> to vector<8x8xf32>
    %61 = vector.extract_strided_slice %24 {offsets = [0, 8], sizes = [8, 8], strides = [1, 1]} : vector<8x32xf32> to vector<8x8xf32>
    %cst_36 = arith.constant dense<0.000000e+00> : vector<8x8xf32>
    %62 = tpu.matmul %57, %58, %cst_36 {dimension_numbers = #tpu.dot_dimension_numbers<[1], [1], [0], [0], [0, 0, 1, 0], [], []>} : vector<8x8xf32>, vector<8x8xf32>, vector<8x8xf32> -> vector<8x8xf32>
    %cst_37 = arith.constant dense<0.000000e+00> : vector<8x8xf32>
    %63 = tpu.matmul %57, %60, %cst_37 {dimension_numbers = #tpu.dot_dimension_numbers<[1], [1], [0], [0], [0, 0, 1, 0], [], []>} : vector<8x8xf32>, vector<8x8xf32>, vector<8x8xf32> -> vector<8x8xf32>
    %cst_38 = arith.constant dense<0xFF800000> : vector<8xf32>
    %64 = vector.multi_reduction <maximumf>, %62, %cst_38 [1] : vector<8x8xf32> to vector<8xf32>
    %65 = vector.shape_cast %64 : vector<8xf32> to vector<8x1xf32>
    %cst_39 = arith.constant dense<0xFF800000> : vector<8xf32>
    %66 = vector.multi_reduction <maximumf>, %63, %cst_39 [1] : vector<8x8xf32> to vector<8xf32>
    %67 = vector.shape_cast %66 : vector<8xf32> to vector<8x1xf32>
    %68 = arith.maximumf %65, %67 : vector<8x1xf32>
    %69 = vector.broadcast %68 : vector<8x1xf32> to vector<8x8xf32>
    %70 = arith.subf %62, %69 : vector<8x8xf32>
    %71 = math.exp %70 : vector<8x8xf32>
    %72 = vector.broadcast %68 : vector<8x1xf32> to vector<8x8xf32>
    %73 = arith.subf %63, %72 : vector<8x8xf32>
    %74 = math.exp %73 : vector<8x8xf32>
    %cst_40 = arith.constant dense<0.000000e+00> : vector<8xf32>
    %75 = vector.multi_reduction <add>, %71, %cst_40 [1] : vector<8x8xf32> to vector<8xf32>
    %76 = vector.shape_cast %75 : vector<8xf32> to vector<8x1xf32>
    %cst_41 = arith.constant dense<0.000000e+00> : vector<8xf32>
    %77 = vector.multi_reduction <add>, %74, %cst_41 [1] : vector<8x8xf32> to vector<8xf32>
    %78 = vector.shape_cast %77 : vector<8xf32> to vector<8x1xf32>
    %79 = arith.addf %76, %78 : vector<8x1xf32>
    %cst_42 = arith.constant 1.000000e+00 : f32
    %80 = vector.broadcast %cst_42 : f32 to vector<8x1xf32>
    %81 = arith.divf %80, %79 : vector<8x1xf32>
    %82 = vector.broadcast %81 : vector<8x1xf32> to vector<8x8xf32>
    %83 = arith.mulf %71, %82 : vector<8x8xf32>
    %84 = vector.broadcast %81 : vector<8x1xf32> to vector<8x8xf32>
    %85 = arith.mulf %74, %84 : vector<8x8xf32>
    %cst_43 = arith.constant dense<0.000000e+00> : vector<8x8xf32>
    %86 = tpu.matmul %83, %59, %cst_43 {dimension_numbers = #tpu.dot_dimension_numbers<[1], [0], [0], [1], [0, 0, 1, 1], [], []>} : vector<8x8xf32>, vector<8x8xf32>, vector<8x8xf32> -> vector<8x8xf32>
    %cst_44 = arith.constant dense<0.000000e+00> : vector<8x8xf32>
    %87 = tpu.matmul %85, %61, %cst_44 {dimension_numbers = #tpu.dot_dimension_numbers<[1], [0], [0], [1], [0, 0, 1, 1], [], []>} : vector<8x8xf32>, vector<8x8xf32>, vector<8x8xf32> -> vector<8x8xf32>
    %88 = arith.addf %86, %87 : vector<8x8xf32>
    %89 = tpu.concatenate %56, %88 in 1 : vector<8x8xf32>, vector<8x8xf32> -> vector<8x16xf32>
    %c0_45 = arith.constant 0 : index
    %c0_46 = arith.constant 0 : index
    %90 = vector.load %arg17[%c0_45, %c0_46] : memref<8x32xf32, #tpu.memory_space<vmem>>, vector<8x16xf32>
    tpu.vector_store %arg17[%c0_45, %c0_46], %89 {strides = array<i32>} : memref<8x32xf32, #tpu.memory_space<vmem>>, vector<8x16xf32>,
    %91 = vector.extract_strided_slice %8 {offsets = [0, 16], sizes = [8, 8], strides = [1, 1]} : vector<8x32xf32> to vector<8x8xf32>
    %92 = vector.extract_strided_slice %17 {offsets = [0, 16], sizes = [8, 8], strides = [1, 1]} : vector<8x32xf32> to vector<8x8xf32>
    %93 = vector.extract_strided_slice %22 {offsets = [0, 16], sizes = [8, 8], strides = [1, 1]} : vector<8x32xf32> to vector<8x8xf32>
    %94 = vector.extract_strided_slice %23 {offsets = [0, 16], sizes = [8, 8], strides = [1, 1]} : vector<8x32xf32> to vector<8x8xf32>
    %95 = vector.extract_strided_slice %24 {offsets = [0, 16], sizes = [8, 8], strides = [1, 1]} : vector<8x32xf32> to vector<8x8xf32>
    %cst_47 = arith.constant dense<0.000000e+00> : vector<8x8xf32>
    %96 = tpu.matmul %91, %92, %cst_47 {dimension_numbers = #tpu.dot_dimension_numbers<[1], [1], [0], [0], [0, 0, 1, 0], [], []>} : vector<8x8xf32>, vector<8x8xf32>, vector<8x8xf32> -> vector<8x8xf32>
    %cst_48 = arith.constant dense<0.000000e+00> : vector<8x8xf32>
    %97 = tpu.matmul %91, %94, %cst_48 {dimension_numbers = #tpu.dot_dimension_numbers<[1], [1], [0], [0], [0, 0, 1, 0], [], []>} : vector<8x8xf32>, vector<8x8xf32>, vector<8x8xf32> -> vector<8x8xf32>
    %cst_49 = arith.constant dense<0xFF800000> : vector<8xf32>
    %98 = vector.multi_reduction <maximumf>, %96, %cst_49 [1] : vector<8x8xf32> to vector<8xf32>
    %99 = vector.shape_cast %98 : vector<8xf32> to vector<8x1xf32>
    %cst_50 = arith.constant dense<0xFF800000> : vector<8xf32>
    %100 = vector.multi_reduction <maximumf>, %97, %cst_50 [1] : vector<8x8xf32> to vector<8xf32>
    %101 = vector.shape_cast %100 : vector<8xf32> to vector<8x1xf32>
    %102 = arith.maximumf %99, %101 : vector<8x1xf32>
    %103 = vector.broadcast %102 : vector<8x1xf32> to vector<8x8xf32>
    %104 = arith.subf %96, %103 : vector<8x8xf32>
    %105 = math.exp %104 : vector<8x8xf32>
    %106 = vector.broadcast %102 : vector<8x1xf32> to vector<8x8xf32>
    %107 = arith.subf %97, %106 : vector<8x8xf32>
    %108 = math.exp %107 : vector<8x8xf32>
    %cst_51 = arith.constant dense<0.000000e+00> : vector<8xf32>
    %109 = vector.multi_reduction <add>, %105, %cst_51 [1] : vector<8x8xf32> to vector<8xf32>
    %110 = vector.shape_cast %109 : vector<8xf32> to vector<8x1xf32>
    %cst_52 = arith.constant dense<0.000000e+00> : vector<8xf32>
    %111 = vector.multi_reduction <add>, %108, %cst_52 [1] : vector<8x8xf32> to vector<8xf32>
    %112 = vector.shape_cast %111 : vector<8xf32> to vector<8x1xf32>
    %113 = arith.addf %110, %112 : vector<8x1xf32>
    %cst_53 = arith.constant 1.000000e+00 : f32
    %114 = vector.broadcast %cst_53 : f32 to vector<8x1xf32>
    %115 = arith.divf %114, %113 : vector<8x1xf32>
    %116 = vector.broadcast %115 : vector<8x1xf32> to vector<8x8xf32>
    %117 = arith.mulf %105, %116 : vector<8x8xf32>
    %118 = vector.broadcast %115 : vector<8x1xf32> to vector<8x8xf32>
    %119 = arith.mulf %108, %118 : vector<8x8xf32>
    %cst_54 = arith.constant dense<0.000000e+00> : vector<8x8xf32>
    %120 = tpu.matmul %117, %93, %cst_54 {dimension_numbers = #tpu.dot_dimension_numbers<[1], [0], [0], [1], [0, 0, 1, 1], [], []>} : vector<8x8xf32>, vector<8x8xf32>, vector<8x8xf32> -> vector<8x8xf32>
    %cst_55 = arith.constant dense<0.000000e+00> : vector<8x8xf32>
    %121 = tpu.matmul %119, %95, %cst_55 {dimension_numbers = #tpu.dot_dimension_numbers<[1], [0], [0], [1], [0, 0, 1, 1], [], []>} : vector<8x8xf32>, vector<8x8xf32>, vector<8x8xf32> -> vector<8x8xf32>
    %122 = arith.addf %120, %121 : vector<8x8xf32>
    %123 = vector.extract_strided_slice %8 {offsets = [0, 24], sizes = [8, 8], strides = [1, 1]} : vector<8x32xf32> to vector<8x8xf32>
    %124 = vector.extract_strided_slice %17 {offsets = [0, 24], sizes = [8, 8], strides = [1, 1]} : vector<8x32xf32> to vector<8x8xf32>
    %125 = vector.extract_strided_slice %22 {offsets = [0, 24], sizes = [8, 8], strides = [1, 1]} : vector<8x32xf32> to vector<8x8xf32>
    %126 = vector.extract_strided_slice %23 {offsets = [0, 24], sizes = [8, 8], strides = [1, 1]} : vector<8x32xf32> to vector<8x8xf32>
    %127 = vector.extract_strided_slice %24 {offsets = [0, 24], sizes = [8, 8], strides = [1, 1]} : vector<8x32xf32> to vector<8x8xf32>
    %cst_56 = arith.constant dense<0.000000e+00> : vector<8x8xf32>
    %128 = tpu.matmul %123, %124, %cst_56 {dimension_numbers = #tpu.dot_dimension_numbers<[1], [1], [0], [0], [0, 0, 1, 0], [], []>} : vector<8x8xf32>, vector<8x8xf32>, vector<8x8xf32> -> vector<8x8xf32>
    %cst_57 = arith.constant dense<0.000000e+00> : vector<8x8xf32>
    %129 = tpu.matmul %123, %126, %cst_57 {dimension_numbers = #tpu.dot_dimension_numbers<[1], [1], [0], [0], [0, 0, 1, 0], [], []>} : vector<8x8xf32>, vector<8x8xf32>, vector<8x8xf32> -> vector<8x8xf32>
    %cst_58 = arith.constant dense<0xFF800000> : vector<8xf32>
    %130 = vector.multi_reduction <maximumf>, %128, %cst_58 [1] : vector<8x8xf32> to vector<8xf32>
    %131 = vector.shape_cast %130 : vector<8xf32> to vector<8x1xf32>
    %cst_59 = arith.constant dense<0xFF800000> : vector<8xf32>
    %132 = vector.multi_reduction <maximumf>, %129, %cst_59 [1] : vector<8x8xf32> to vector<8xf32>
    %133 = vector.shape_cast %132 : vector<8xf32> to vector<8x1xf32>
    %134 = arith.maximumf %131, %133 : vector<8x1xf32>
    %135 = vector.broadcast %134 : vector<8x1xf32> to vector<8x8xf32>
    %136 = arith.subf %128, %135 : vector<8x8xf32>
    %137 = math.exp %136 : vector<8x8xf32>
    %138 = vector.broadcast %134 : vector<8x1xf32> to vector<8x8xf32>
    %139 = arith.subf %129, %138 : vector<8x8xf32>
    %140 = math.exp %139 : vector<8x8xf32>
    %cst_60 = arith.constant dense<0.000000e+00> : vector<8xf32>
    %141 = vector.multi_reduction <add>, %137, %cst_60 [1] : vector<8x8xf32> to vector<8xf32>
    %142 = vector.shape_cast %141 : vector<8xf32> to vector<8x1xf32>
    %cst_61 = arith.constant dense<0.000000e+00> : vector<8xf32>
    %143 = vector.multi_reduction <add>, %140, %cst_61 [1] : vector<8x8xf32> to vector<8xf32>
    %144 = vector.shape_cast %143 : vector<8xf32> to vector<8x1xf32>
    %145 = arith.addf %142, %144 : vector<8x1xf32>
    %cst_62 = arith.constant 1.000000e+00 : f32
    %146 = vector.broadcast %cst_62 : f32 to vector<8x1xf32>
    %147 = arith.divf %146, %145 : vector<8x1xf32>
    %148 = vector.broadcast %147 : vector<8x1xf32> to vector<8x8xf32>
    %149 = arith.mulf %137, %148 : vector<8x8xf32>
    %150 = vector.broadcast %147 : vector<8x1xf32> to vector<8x8xf32>
    %151 = arith.mulf %140, %150 : vector<8x8xf32>
    %cst_63 = arith.constant dense<0.000000e+00> : vector<8x8xf32>
    %152 = tpu.matmul %149, %125, %cst_63 {dimension_numbers = #tpu.dot_dimension_numbers<[1], [0], [0], [1], [0, 0, 1, 1], [], []>} : vector<8x8xf32>, vector<8x8xf32>, vector<8x8xf32> -> vector<8x8xf32>
    %cst_64 = arith.constant dense<0.000000e+00> : vector<8x8xf32>
    %153 = tpu.matmul %151, %127, %cst_64 {dimension_numbers = #tpu.dot_dimension_numbers<[1], [0], [0], [1], [0, 0, 1, 1], [], []>} : vector<8x8xf32>, vector<8x8xf32>, vector<8x8xf32> -> vector<8x8xf32>
    %154 = arith.addf %152, %153 : vector<8x8xf32>
    %155 = tpu.concatenate %122, %154 in 1 : vector<8x8xf32>, vector<8x8xf32> -> vector<8x16xf32>
    %c0_65 = arith.constant 0 : index
    %c16 = arith.constant 16 : index
    %156 = vector.load %arg17[%c0_65, %c16] : memref<8x32xf32, #tpu.memory_space<vmem>>, vector<8x16xf32>
    tpu.vector_store %arg17[%c0_65, %c16], %155 {strides = array<i32>} : memref<8x32xf32, #tpu.memory_space<vmem>>, vector<8x16xf32>,
    %c0_66 = arith.constant 0 : index
    %c0_67 = arith.constant 0 : index
    %157 = vector.load %arg17[%c0_66, %c0_67] : memref<8x32xf32, #tpu.memory_space<vmem>>, vector<8x32xf32>
    %c0_68 = arith.constant 0 : index
    %c0_69 = arith.constant 0 : index
    %158 = vector.load %arg10[%c0_68, %c0_69] : memref<32x32xf32, #tpu.memory_space<vmem>>, vector<32x32xf32>
    %cst_70 = arith.constant dense<0.000000e+00> : vector<8x32xf32>
    %159 = tpu.matmul %157, %158, %cst_70 {dimension_numbers = #tpu.dot_dimension_numbers<[1], [0], [0], [1], [0, 0, 1, 1], [], []>} : vector<8x32xf32>, vector<32x32xf32>, vector<8x32xf32> -> vector<8x32xf32>
    %c0_71 = arith.constant 0 : index
    %c0_72 = arith.constant 0 : index
    %160 = vector.load %arg11[%c0_71, %c0_72] : memref<1x32xf32, #tpu.memory_space<vmem>>, vector<1x32xf32>
    %161 = vector.broadcast %160 : vector<1x32xf32> to vector<8x32xf32>
    %162 = arith.addf %159, %161 : vector<8x32xf32>
    %c0_73 = arith.constant 0 : index
    %c0_74 = arith.constant 0 : index
    %c0_75 = arith.constant 0 : index
    %163 = vector.load %arg1[%c0_73, %c0_74, %c0_75] : memref<1x8x32xf32, #tpu.memory_space<vmem>>, vector<1x8x32xf32>
    %164 = vector.shape_cast %163 : vector<1x8x32xf32> to vector<8x32xf32>
    %165 = arith.addf %164, %162 : vector<8x32xf32>
    %cst_76 = arith.constant dense<0.000000e+00> : vector<8xf32>
    %166 = vector.multi_reduction <add>, %165, %cst_76 [1] : vector<8x32xf32> to vector<8xf32>
    %167 = vector.shape_cast %166 : vector<8xf32> to vector<8x1xf32>
    %cst_77 = arith.constant 3.200000e+01 : f32
    %168 = vector.broadcast %cst_77 : f32 to vector<8x1xf32>
    %169 = arith.divf %167, %168 : vector<8x1xf32>
    %170 = vector.broadcast %169 : vector<8x1xf32> to vector<8x32xf32>
    %171 = arith.subf %165, %170 : vector<8x32xf32>
    %172 = arith.mulf %171, %171 : vector<8x32xf32>
    %cst_78 = arith.constant dense<0.000000e+00> : vector<8xf32>
    %173 = vector.multi_reduction <add>, %172, %cst_78 [1] : vector<8x32xf32> to vector<8xf32>
    %174 = vector.shape_cast %173 : vector<8xf32> to vector<8x1xf32>
    %cst_79 = arith.constant 3.200000e+01 : f32
    %175 = vector.broadcast %cst_79 : f32 to vector<8x1xf32>
    %176 = arith.divf %174, %175 : vector<8x1xf32>
    %cst_80 = arith.constant 9.99999974E-6 : f32
    %177 = vector.broadcast %cst_80 : f32 to vector<8x1xf32>
    %178 = arith.addf %176, %177 : vector<8x1xf32>
    %179 = math.rsqrt %178 : vector<8x1xf32>
    %180 = vector.broadcast %179 : vector<8x1xf32> to vector<8x32xf32>
    %181 = arith.mulf %171, %180 : vector<8x32xf32>
    %c0_81 = arith.constant 0 : index
    %c0_82 = arith.constant 0 : index
    %182 = vector.load %arg14[%c0_81, %c0_82] : memref<1x32xf32, #tpu.memory_space<vmem>>, vector<1x32xf32>
    %183 = vector.broadcast %182 : vector<1x32xf32> to vector<8x32xf32>
    %184 = arith.mulf %181, %183 : vector<8x32xf32>
    %c0_83 = arith.constant 0 : index
    %c0_84 = arith.constant 0 : index
    %185 = vector.load %arg15[%c0_83, %c0_84] : memref<1x32xf32, #tpu.memory_space<vmem>>, vector<1x32xf32>
    %186 = vector.broadcast %185 : vector<1x32xf32> to vector<8x32xf32>
    %187 = arith.addf %184, %186 : vector<8x32xf32>
    %188 = vector.shape_cast %187 : vector<8x32xf32> to vector<1x8x32xf32>
    %c0_85 = arith.constant 0 : index
    %c0_86 = arith.constant 0 : index
    %c0_87 = arith.constant 0 : index
    %189 = vector.load %arg16[%c0_85, %c0_86, %c0_87] : memref<1x8x32xf32, #tpu.memory_space<vmem>>, vector<1x8x32xf32>
    tpu.vector_store %arg16[%c0_85, %c0_86, %c0_87], %188 {strides = array<i32>} : memref<1x8x32xf32, #tpu.memory_space<vmem>>, vector<1x8x32xf32>,
    return
  }
  func.func @transform_0(%arg0: i32) -> (i32, i32, i32) {
    %c0_i32 = arith.constant 0 : i32
    %c0_i32_0 = arith.constant 0 : i32
    %c0_i32_1 = arith.constant 0 : i32
    return %arg0, %c0_i32, %c0_i32_0 : i32, i32, i32
  }
  func.func @transform_1(%arg0: i32) -> (i32, i32, i32) {
    %c0_i32 = arith.constant 0 : i32
    %c0_i32_0 = arith.constant 0 : i32
    %c0_i32_1 = arith.constant 0 : i32
    return %arg0, %c0_i32, %c0_i32_0 : i32, i32, i32
  }
  func.func @transform_2(%arg0: i32) -> (i32, i32, i32) {
    %c0_i32 = arith.constant 0 : i32
    %c0_i32_0 = arith.constant 0 : i32
    %c0_i32_1 = arith.constant 0 : i32
    return %arg0, %c0_i32, %c0_i32_0 : i32, i32, i32
  }
  func.func @transform_3(%arg0: i32) -> (i32, i32) {
    %c0_i32 = arith.constant 0 : i32
    %c0_i32_0 = arith.constant 0 : i32
    %c0_i32_1 = arith.constant 0 : i32
    return %c0_i32, %c0_i32_0 : i32, i32
  }
  func.func @transform_4(%arg0: i32) -> (i32, i32) {
    %c0_i32 = arith.constant 0 : i32
    %c0_i32_0 = arith.constant 0 : i32
    %c0_i32_1 = arith.constant 0 : i32
    return %c0_i32, %c0_i32_0 : i32, i32
  }
  func.func @transform_5(%arg0: i32) -> (i32, i32) {
    %c0_i32 = arith.constant 0 : i32
    %c0_i32_0 = arith.constant 0 : i32
    %c0_i32_1 = arith.constant 0 : i32
    return %c0_i32, %c0_i32_0 : i32, i32
  }
  func.func @transform_6(%arg0: i32) -> (i32, i32) {
    %c0_i32 = arith.constant 0 : i32
    %c0_i32_0 = arith.constant 0 : i32
    %c0_i32_1 = arith.constant 0 : i32
    return %c0_i32, %c0_i32_0 : i32, i32
  }
  func.func @transform_7(%arg0: i32) -> (i32, i32) {
    %c0_i32 = arith.constant 0 : i32
    %c0_i32_0 = arith.constant 0 : i32
    %c0_i32_1 = arith.constant 0 : i32
    return %c0_i32, %c0_i32_0 : i32, i32
  }
  func.func @transform_8(%arg0: i32) -> (i32, i32) {
    %c0_i32 = arith.constant 0 : i32
    %c0_i32_0 = arith.constant 0 : i32
    %c0_i32_1 = arith.constant 0 : i32
    return %c0_i32, %c0_i32_0 : i32, i32
  }
  func.func @transform_9(%arg0: i32) -> (i32, i32) {
    %c0_i32 = arith.constant 0 : i32
    %c0_i32_0 = arith.constant 0 : i32
    %c0_i32_1 = arith.constant 0 : i32
    return %c0_i32, %c0_i32_0 : i32, i32
  }
  func.func @transform_10(%arg0: i32) -> (i32, i32) {
    %c0_i32 = arith.constant 0 : i32
    %c0_i32_0 = arith.constant 0 : i32
    %c0_i32_1 = arith.constant 0 : i32
    return %c0_i32, %c0_i32_0 : i32, i32
  }
  func.func @transform_11(%arg0: i32) -> (i32, i32) {
    %c0_i32 = arith.constant 0 : i32
    %c0_i32_0 = arith.constant 0 : i32
    %c0_i32_1 = arith.constant 0 : i32
    return %c0_i32, %c0_i32_0 : i32, i32
  }
  func.func @transform_12(%arg0: i32) -> (i32, i32) {
    %c0_i32 = arith.constant 0 : i32
    %c0_i32_0 = arith.constant 0 : i32
    %c0_i32_1 = arith.constant 0 : i32
    return %c0_i32, %c0_i32_0 : i32, i32
  }
  func.func @transform_13(%arg0: i32) -> (i32, i32) {
    %c0_i32 = arith.constant 0 : i32
    %c0_i32_0 = arith.constant 0 : i32
    %c0_i32_1 = arith.constant 0 : i32
    return %c0_i32, %c0_i32_0 : i32, i32
  }
  func.func @transform_14(%arg0: i32) -> (i32, i32) {
    %c0_i32 = arith.constant 0 : i32
    %c0_i32_0 = arith.constant 0 : i32
    %c0_i32_1 = arith.constant 0 : i32
    return %c0_i32, %c0_i32_0 : i32, i32
  }
  func.func @transform_15(%arg0: i32) -> (i32, i32, i32) {
    %c0_i32 = arith.constant 0 : i32
    %c0_i32_0 = arith.constant 0 : i32
    %c0_i32_1 = arith.constant 0 : i32
    return %arg0, %c0_i32, %c0_i32_0 : i32, i32, i32
  }
}

</mosaic_0001>

<bundles_post_ra>
// kernel: tpu_custom_call.1
= control target key start
LH: loop header
LB: loop body
LE: loop exit
PB: predicated region body
PF: predicated region fallthrough
CT: control target
= control target key end

     0   :  { %s4099_s0 = inlined_call_operand.hbm [shape: f32[2,8,32], index: 0, kind: input, shape index: {}]   ;;  %s4100_s1 = inlined_call_operand.hbm [shape: f32[2,8,32], index: 1, kind: input, shape index: {}]   ;;  %s4101_s2 = inlined_call_operand.hbm [shape: f32[2,8,32], index: 2, kind: input, shape index: {}]   ;;  %s4102_s3 = inlined_call_operand.hbm [shape: f32[32,32], index: 3, kind: input, shape index: {}]   ;;  %s4103_s4 = inlined_call_operand.vmem [shape: f32[1,32], index: 4, kind: input, shape index: {}]   ;;  %s4104_s5 = inlined_call_operand.hbm [shape: f32[32,32], index: 5, kind: input, shape index: {}]   ;;  %s4105_s6 = inlined_call_operand.hbm [shape: f32[1,32], index: 6, kind: input, shape index: {}]   ;;  %s4106_s7 = inlined_call_operand.hbm [shape: f32[32,32], index: 7, kind: input, shape index: {}]   ;;  %s4107_s8 = inlined_call_operand.hbm [shape: f32[1,32], index: 8, kind: input, shape index: {}]   ;;  %s4108_s9 = inlined_call_operand.vmem [shape: f32[32,32], index: 9, kind: input, shape index: {}]   ;;  %s4109_s10 = inlined_call_operand.hbm [shape: f32[1,32], index: 10, kind: input, shape index: {}]   ;;  %s4110_s11 = inlined_call_operand.vmem [shape: f32[8,32], index: 11, kind: input, shape index: {}]   ;;  %s4111_s12 = inlined_call_operand.hbm [shape: f32[8,32], index: 12, kind: input, shape index: {}]   ;;  %s4112_s13 = inlined_call_operand.vmem [shape: f32[1,32], index: 13, kind: input, shape index: {}]   ;;  %s4113_s14 = inlined_call_operand.vmem [shape: f32[1,32], index: 14, kind: input, shape index: {}]   ;;  %s4114_s15 = inlined_call_operand.hbm [shape: f32[2,8,32], index: 15, kind: output, shape index: {}]  }
   0x1   :  { %4142 = sst [smem:[#allocation35_spill]] %s4100_s1 }
   0x2   :  { %4143 = sst [smem:[#allocation36_spill]] %s4102_s3 }
   0x3   :  { %4144 = sst [smem:[#allocation37_spill]] %s4103_s4 }
   0x4   :  { %4145 = sst [smem:[#allocation38_spill]] %s4104_s5 }
   0x5   :  { %4146 = sst [smem:[#allocation39_spill]] %s4105_s6 }
   0x6   :  { %4147 = sst [smem:[#allocation40_spill]] %s4107_s8 }
   0x7   :  { %4148 = sst [smem:[#allocation41_spill]] %s4108_s9 }
   0x8   :  { %4149 = sst [smem:[#allocation42_spill]] %s4110_s11 }
   0x9   :  { %4150 = sst [smem:[#allocation43_spill]] %s4112_s13 }
   0xa   :  { %4151 = sst [smem:[#allocation44_spill]] %s4113_s14 }
   0xb   :  { %4152 = sst [smem:[#allocation45_spill]] %s4114_s15 }
   0xc   :  { %20 = vsyncpa [#allocation4], 0 }
   0xd   :  { %22 = vsyncpa [#allocation4 + $0x1], 0 }
   0xe   :  { %23 = vsyncpa [#allocation7], 0 }
   0xf   :  { %25 = vsyncpa [#allocation7 + $0x1], 0 }
  0x10   :  { %26 = vsyncpa [#allocation10], 0 }
  0x11   :  { %27 = vsyncpa [#allocation13], 0 }
  0x12   :  { %28 = vsyncpa [#allocation16], 0 }
  0x13   :  { %29 = vsyncpa [#allocation19], 0 }
  0x14   :  { %30 = vsyncpa [#allocation5], 0 }
  0x15   :  { %32 = vsyncpa [#allocation5 + $0x1], 0  ;;  %s3482_s18 = smov 0   ;;  %s3484_s19 = smov 0  }
  0x16   :  { %s3486_s20 = smov 0   ;;  %s3488_s21 = smov 0  }
  0x17 LB: > { %4153 = sst [smem:[#allocation28_spill]] %s3367_s18  ;;  %s3381_s22 = smov [#allocation9]   ;;  %s3379_s21 = sphi %s3488_s21, %s4206_s21   ;;  %s3375_s20 = sphi %s3486_s20, %s4210_s20   ;;  %s3371_s19 = sphi %s3484_s19, %s4209_s19   ;;  %s3367_s18 = sphi %s3482_s18, %s4208_s18  }
  0x18   : > { %4154 = sst [smem:[#allocation29_spill]] %s3379_s21  ;;  %s411_s23 = sshll.u32 %s3381_s22, 4  ;;  %s3508_s23 = int_to_ptr.vmem [resolvable:$true] %s411_s23 }
  0x19   : > { %s3503_s24 = sadd.s32 4294967295, %s3379_s21   ;;  %p2571_p0 = scmp.ge.s32.totalorder %s3379_s21, 1 }
  0x1a   : > { %p4126_p1 = scmp.eq.s32.totalorder %s3503_s24, 0  ;;  %p399_p2 = scmp.lt.s32.totalorder %s3379_s21, 3 }
  0x1b   : > { %s3382_s26 = smov [#allocation12]   ;;  %s3383_s29 = smov [#allocation15]  }
  0x1c   : > { %p3510_p3 = pnand %p2571_p0, %p399_p2  ;;  %s441_s27 = sshll.u32 %s3382_s26, 4  ;;  %s3523_s27 = int_to_ptr.vmem [resolvable:$true] %s441_s27 }
  0x1d   : > { %s465_s30 = sshll.u32 %s3383_s29, 4  ;;  %s4158_s3 = sld [smem:[#allocation36_spill]]  ;;  %s3525_s30 = int_to_ptr.vmem [resolvable:$true] %s465_s30 }
  0x1e   : > { %s4155_s25 = scalar_select %p3510_p3, 1, 0 }
  0x1f   : > { %p2880_p5 = pneg %p3510_p3 }
  0x20   : > { %4156 = sst [smem:[#allocation30_spill]] %s4155_s25 }
  0x21   : > { %p3519_p6 = pnand %p2880_p5, %p4126_p1 }
  0x23   : > { %s4157_s28 = scalar_select %p3519_p6, 1, 0 }
  0x24   : > { %s3007_s22 = scalar_lea.hbm %s4158_s3, 512  ;;  %p3535_p8 = pneg %p3519_p6 }
  0x25   : > { %p3008_p7 = scmp.ne.s32.totalorder %s4158_s3, %s3007_s22  ;;  %p3014_p11 = scmp.lt.u32.totalorder %s3007_s22, %s4158_s3 }
  0x26   : > { %s4159_s26 = scalar_select %p3535_p8, 1, 0 }
  0x27   : > { %p3010_p9 = pnand %p3535_p8, %p3008_p7 }
  0x29   : > { %p3011_p10 = pneg %p3010_p9 }
  0x2b   : > { %p3016_p12 = pnand %p3014_p11, %p3011_p10 }
  0x2d   : > { %3019 = shalt.err (!%p3016_p12)
}
  0x2e   : > { %s3020_s14 = scalar_lea.vmem %s3508_s23, 512  ;;  %p3028_p5 = scmp.lt.s32.totalorder %s3508_s23, %s3508_s23 }
  0x2f   : > { %p3021_p13 = scmp.ne.s32.totalorder %s3508_s23, %s3020_s14  ;;  %p3029_p4 = scmp.lt.s32.totalorder %s3020_s14, %s3020_s14 }
  0x31   : > { %p3023_p0 = pnand %p3021_p13, %p3535_p8  ;;  %p3030_p7 = por %p3029_p4, %p3028_p5 }
  0x33   : > { %p3024_p2 = pneg %p3023_p0 }
  0x35   : > { %p3031_p9 = pnand %p3030_p7, %p3024_p2 }
  0x37   : > { %3034 = shalt.err (!%p3031_p9)
}
  0x38   : > { %s4119_s15 = smov 128   ;;  %s4122_s13 = smov 8  }
  0x39   : > { %2883 = dma.hbm_to_vmem [thread:$0]  (!%p3519_p6), %s4158_s3, 512, %s3508_s23, [#allocation10], %s4119_s15, %s4119_s15, %s4122_s13  }
  0x3a   : > { %s4160_s6 = sld [smem:[#allocation39_spill]] }
  0x40   : > { %s3035_s14 = scalar_lea.hbm %s4160_s6, 16 }
  0x41   : > { %p3036_p4 = scmp.ne.s32.totalorder %s4160_s6, %s3035_s14  ;;  %p3042_p12 = scmp.lt.u32.totalorder %s3035_s14, %s4160_s6 }
  0x43   : > { %p3038_p10 = pnand %p3036_p4, %p3535_p8 }
  0x45   : > { %p3039_p11 = pneg %p3038_p10 }
  0x47   : > { %p3044_p13 = pnand %p3042_p12, %p3039_p11 }
  0x49   : > { %3047 = shalt.err (!%p3044_p13)
}
  0x4a   : > { %s3048_s23 = scalar_lea.vmem %s3523_s27, 16  ;;  %s3055_s4 = scalar_lea.vmem %s3523_s27, 32 }
  0x4b   : > { %p3049_p0 = scmp.ne.s32.totalorder %s3523_s27, %s3048_s23  ;;  %p3056_p7 = scmp.lt.s32.totalorder %s3523_s27, %s3523_s27 }
  0x4c   : > { %p3057_p9 = scmp.lt.s32.totalorder %s3055_s4, %s3048_s23 }
  0x4d   : > { %p3051_p2 = pnand %p3049_p0, %p3535_p8 }
  0x4e   : > { %p3058_p4 = por %p3057_p9, %p3056_p7 }
  0x4f   : > { %p3052_p5 = pneg %p3051_p2 }
  0x51   : > { %p3059_p10 = pnand %p3058_p4, %p3052_p5 }
  0x53   : > { %3062 = shalt.err (!%p3059_p10)
}
  0x54   : > { %2889 = dma.hbm_to_vmem [thread:$0]  (!%p3519_p6), %s4160_s6, 16, %s3523_s27, [#allocation13]  }
  0x55   : > { %s4161_s8 = sld [smem:[#allocation40_spill]] }
  0x5b   : > { %s3063_s17 = scalar_lea.hbm %s4161_s8, 16 }
  0x5c   : > { %p3064_p11 = scmp.ne.s32.totalorder %s4161_s8, %s3063_s17  ;;  %p3070_p0 = scmp.lt.u32.totalorder %s3063_s17, %s4161_s8 }
  0x5e   : > { %p3066_p12 = pnand %p3064_p11, %p3535_p8 }
  0x60   : > { %p3067_p13 = pneg %p3066_p12 }
  0x62   : > { %p3072_p2 = pnand %p3070_p0, %p3067_p13 }
  0x64   : > { %3075 = shalt.err (!%p3072_p2)
}
  0x65   : > { %s3076_s27 = scalar_lea.vmem %s3525_s30, 16  ;;  %s3083_s4 = scalar_lea.vmem %s3525_s30, 32 }
  0x66   : > { %p3077_p5 = scmp.ne.s32.totalorder %s3525_s30, %s3076_s27  ;;  %p3084_p4 = scmp.lt.s32.totalorder %s3525_s30, %s3525_s30 }
  0x67   : > { %p3085_p10 = scmp.lt.s32.totalorder %s3083_s4, %s3076_s27 }
  0x68   : > { %p3079_p7 = pnand %p3077_p5, %p3535_p8 }
  0x69   : > { %p3086_p11 = por %p3085_p10, %p3084_p4 }
  0x6a   : > { %p3080_p9 = pneg %p3079_p7 }
  0x6c   : > { %p3087_p12 = pnand %p3086_p11, %p3080_p9 }
  0x6e   : > { %3090 = shalt.err (!%p3087_p12)
}
  0x6f   : > { %2895 = dma.hbm_to_vmem [thread:$0]  (!%p3519_p6), %s4161_s8, 16, %s3525_s30, [#allocation16]  }
  0x70   : > { %s2570_s25 = sadd.s32 4294967294, %s3379_s21   ;;  %s3609_s16 = sadd.s32 1, %s3379_s21  }
  0x71   : > { %4162 = sst [smem:[#allocation31_spill]] %s3609_s16  ;;  %s45_s17 = sadd.s32 1, %s3375_s20 }
  0x72   : > { %s42_s22 = ssub.s32 %s3379_s21, %s3609_s16  ;;  %p52_p13 = scmp.ne.s32.totalorder %s3375_s20, %s3371_s19 }
  0x73   : > { %p43_p0 = scmp.eq.s32.totalorder %s42_s22, 0  ;;  %p53_p2 = scmp.eq.s32.totalorder %s3379_s21, 0 }
  0x74   : > { %p58_p5 = scmp.ne.s32.totalorder %s3371_s19, %s3367_s18  ;;  %p386_p7 = scmp.eq.s32.totalorder %s3503_s24, 1 }
  0x75   : > { %s3621_s29 = scalar_select %p43_p0, %s3375_s20, %s45_s17  }
  0x76   : > { %p54_p9 = por %p53_p2, %p52_p13  ;;  %p3625_p4 = por %p4126_p1, %p58_p5 }
  0x77   : > { %4163 = sst [smem:[#allocation32_spill]] %s3621_s29  ;;  %p3629_p10 = por %p386_p7, %p52_p13 }
  0x78   : > { %s4164_s30 = scalar_select %p3625_p4, 1, 0 }
  0x79   : > { %s4165_s14 = scalar_select %p3629_p10, 1, 0 }
  0x7a   : > { %p392_p11 = scmp.eq.s32.totalorder %s2570_s25, 1  ;;  %p2923_p12 = scmp.lt.s32.totalorder %s3379_s21, 2 }
  0x7b   : > { %4166 = sst [smem:[#allocation33_spill]] %s4165_s14  ;;  %s4121_s23 = sand.u32 1, %s3375_s20  }
  0x7c   : > { %p3635_p3 = por %p392_p11, %p58_p5  ;;  %s3641_s4 = sshll.u32 %s4121_s23, 3 }
  0x7d   : > { %s3644_s9 = sshll.u32 %s3379_s21, 7  ;;  %p3646_p0 = pnand %p2923_p12, %p54_p9 }
  0x7e   : > { %s4167_s27 = scalar_select %p3635_p3, 1, 0 }
  0x7f   : > { %s4169_s11 = scalar_select %p3646_p0, 1, 0 }
  0x80   : > { %4168 = sst [smem:[#allocation34_spill]] %s4167_s27  ;;  %s528_s17 = sand.u32 1, %s3379_s21  }
  0x81   : > { %s4170_s1 = sld [smem:[#allocation35_spill]]  ;;  %s532_s23 = scalar_lea.vmem [#allocation6], %s3641_s4 }
  0x82   : > { %s539_s13 = sshll.u32 %s532_s23, 4  ;;  %s3660_s3 = scalar_lea.sflag [#allocation7], %s528_s17  ;;  %s3658_s13 = int_to_ptr.vmem [resolvable:$true] %s539_s13 }
  0x83   : > { %p3666_p2 = pneg %p3646_p0 }
  0x85   : > { %s4171_s8 = scalar_select %p3666_p2, 1, 0 }
  0x87   : > { %s3655_s15 = scalar_lea.hbm %s4170_s1, %s3644_s9  ;;  %s3096_s29 = scalar_lea.hbm %s4170_s1, 256 }
  0x88   : > { %s3091_s6 = scalar_lea.hbm %s3655_s15, 128  ;;  %p3097_p9 = scmp.lt.u32.totalorder %s3655_s15, %s4170_s1 }
  0x89   : > { %p3092_p13 = scmp.ne.s32.totalorder %s3655_s15, %s3091_s6  ;;  %p3098_p11 = scmp.lt.u32.totalorder %s3096_s29, %s3091_s6 }
  0x8a   : > { %p3100_p1 = scmp.lt.u32.totalorder %s3091_s6, %s3655_s15 }
  0x8b   : > { %p3094_p5 = pnand %p3666_p2, %p3092_p13  ;;  %p3099_p12 = por %p3098_p11, %p3097_p9 }
  0x8d   : > { %p3095_p7 = pneg %p3094_p5  ;;  %p3101_p3 = por %p3100_p1, %p3099_p12 }
  0x8f   : > { %p3102_p10 = pnand %p3101_p3, %p3095_p7 }
  0x91   : > { %3105 = shalt.err (!%p3102_p10)
}
  0x92   : > { %s3106_s17 = scalar_lea.vmem %s3658_s13, 128  ;;  %s3386_s25 = smov [#allocation6]  }
  0x93   : > { %p3107_p13 = scmp.ne.s32.totalorder %s3658_s13, %s3106_s17  ;;  %s3111_s22 = sshll.u32 %s3386_s25, 4  ;;  %s3112_s22 = int_to_ptr.vmem [resolvable:$false] %s3111_s22 }
  0x94   : > { %s3113_s16 = scalar_lea.vmem %s3112_s22, 256  ;;  %p3114_p6 = scmp.lt.s32.totalorder %s3658_s13, %s3112_s22 }
  0x95   : > { %p3109_p5 = pnand %p3107_p13, %p3666_p2  ;;  %p3115_p8 = scmp.lt.s32.totalorder %s3113_s16, %s3106_s17 }
  0x97   : > { %p3110_p4 = pneg %p3109_p5  ;;  %p3116_p9 = por %p3115_p8, %p3114_p6 }
  0x99   : > { %p3117_p11 = pnand %p3116_p9, %p3110_p4 }
  0x9b   : > { %3120 = shalt.err (!%p3117_p11)
}
  0x9c   : > { %2908 = dma.hbm_to_vmem [thread:$0]  (!%p3646_p0), %s3655_s15, 128, %s3658_s13, %s3660_s3  }
  0x9d   : > { %s3387_s6 = smov [#allocation11]   ;;  %s3388_s23 = smov [#allocation14]  }
  0x9e   : > { %s427_s29 = sshll.u32 %s3387_s6, 4  ;;  %s451_s1 = sshll.u32 %s3388_s23, 4  ;;  %s428_s29 = int_to_ptr.vmem [resolvable:$true] %s427_s29  ;;  %s452_s1 = int_to_ptr.vmem [resolvable:$true] %s451_s1 }
  0x9f   : > { %s4172_s5 = sld [smem:[#allocation38_spill]]  ;;  %p4173_p3 = scmp.ne.s32.totalorder %s4159_s26, 0 }
  0xa5   : > { %s3121_s22 = scalar_lea.hbm %s4172_s5, 512 }
  0xa6   : > { %p3122_p1 = scmp.ne.s32.totalorder %s4172_s5, %s3121_s22  ;;  %p3128_p4 = scmp.lt.u32.totalorder %s3121_s22, %s4172_s5 }
  0xa8   : > { %p3124_p6 = pnand %p3122_p1, %p4173_p3 }
  0xaa   : > { %p3125_p8 = pneg %p3124_p6 }
  0xac   : > { %p3130_p10 = pnand %p3128_p4, %p3125_p8 }
  0xae   : > { %3133 = shalt.err (!%p3130_p10)
}
  0xaf   : > { %s3134_s15 = scalar_lea.vmem %s428_s29, 512  ;;  %p3142_p5 = scmp.lt.s32.totalorder %s428_s29, %s428_s29 }
  0xb0   : > { %p3135_p7 = scmp.ne.s32.totalorder %s428_s29, %s3134_s15  ;;  %p3143_p9 = scmp.lt.s32.totalorder %s3134_s15, %s3134_s15 }
  0xb2   : > { %p3137_p12 = pnand %p3135_p7, %p4173_p3  ;;  %p3144_p11 = por %p3143_p9, %p3142_p5 }
  0xb4   : > { %p3138_p13 = pneg %p3137_p12 }
  0xb6   : > { %p3145_p0 = pnand %p3144_p11, %p3138_p13 }
  0xb8   : > { %3148 = shalt.err (!%p3145_p0)
}
  0xb9   : > { %p4174_p1 = scmp.ne.s32.totalorder %s4157_s28, 0  ;;  %s4175_s21 = smov 8  }
  0xba   : > { %s4176_s13 = smov 128   ;;  %s3149_s25 = scalar_lea.hbm %s4106_s7, 512 }
  0xbb   : > { %2886 = dma.hbm_to_vmem [thread:$0]  (!%p4174_p1), %s4172_s5, 512, %s428_s29, [#allocation10], %s4176_s13, %s4176_s13, %s4175_s21  }
  0xbc   : > { %p3150_p6 = scmp.ne.s32.totalorder %s4106_s7, %s3149_s25  ;;  %p3156_p4 = scmp.lt.u32.totalorder %s3149_s25, %s4106_s7 }
  0xbe   : > { %p3152_p0 = pnand %p3150_p6, %p4173_p3 }
  0xc0   : > { %p3153_p8 = pneg %p3152_p0 }
  0xc2   : > { %p3158_p10 = pnand %p3156_p4, %p3153_p8 }
  0xc4   : > { %3161 = shalt.err (!%p3158_p10)
}
  0xc5   : > { %s3162_s18 = scalar_lea.vmem %s452_s1, 512  ;;  %p3170_p5 = scmp.lt.s32.totalorder %s452_s1, %s452_s1 }
  0xc6   : > { %p3163_p7 = scmp.ne.s32.totalorder %s452_s1, %s3162_s18  ;;  %p3171_p9 = scmp.lt.s32.totalorder %s3162_s18, %s3162_s18 }
  0xc8   : > { %p3165_p12 = pnand %p3163_p7, %p4173_p3  ;;  %p3172_p11 = por %p3171_p9, %p3170_p5 }
  0xca   : > { %p3166_p13 = pneg %p3165_p12 }
  0xcc   : > { %p3173_p2 = pnand %p3172_p11, %p3166_p13 }
  0xce   : > { %3176 = shalt.err (!%p3173_p2)
}
  0xcf   : > { %2892 = dma.hbm_to_vmem [thread:$0]  (!%p4174_p1), %s4106_s7, 512, %s452_s1, [#allocation13], %s4176_s13, %s4176_s13, %s4175_s21  }
  0xd0   : > { %s3389_s6 = smov [#allocation17]   ;;  %s3390_s25 = smov [#allocation18]  }
  0xd1   : > { %s479_s23 = sshll.u32 %s3389_s6, 4  ;;  %s493_s22 = sshll.u32 %s3390_s25, 4  ;;  %s480_s23 = int_to_ptr.vmem [resolvable:$true] %s479_s23  ;;  %s494_s22 = int_to_ptr.vmem [resolvable:$true] %s493_s22 }
  0xd2   : > { %s3177_s15 = scalar_lea.hbm %s4109_s10, 16 }
  0xd3   : > { %p3178_p2 = scmp.ne.s32.totalorder %s4109_s10, %s3177_s15  ;;  %p3184_p8 = scmp.lt.u32.totalorder %s3177_s15, %s4109_s10 }
  0xd5   : > { %p3180_p6 = pnand %p3178_p2, %p4173_p3 }
  0xd7   : > { %p3181_p0 = pneg %p3180_p6 }
  0xd9   : > { %p3186_p4 = pnand %p3184_p8, %p3181_p0 }
  0xdb   : > { %3189 = shalt.err (!%p3186_p4)
}
  0xdc   : > { %s3190_s1 = scalar_lea.vmem %s480_s23, 16  ;;  %s3197_s21 = scalar_lea.vmem %s480_s23, 32 }
  0xdd   : > { %p3191_p10 = scmp.ne.s32.totalorder %s480_s23, %s3190_s1  ;;  %p3198_p13 = scmp.lt.s32.totalorder %s480_s23, %s480_s23 }
  0xde   : > { %p3199_p5 = scmp.lt.s32.totalorder %s3197_s21, %s3190_s1 }
  0xdf   : > { %p3193_p7 = pnand %p3191_p10, %p4173_p3 }
  0xe0   : > { %p3200_p9 = por %p3199_p5, %p3198_p13 }
  0xe1   : > { %p3194_p12 = pneg %p3193_p7 }
  0xe3   : > { %p3201_p11 = pnand %p3200_p9, %p3194_p12 }
  0xe5   : > { %3204 = shalt.err (!%p3201_p11)
}
  0xe6   : > { %2898 = dma.hbm_to_vmem [thread:$0]  (!%p4174_p1), %s4109_s10, 16, %s480_s23, [#allocation16]  }
  0xe7   : > { %s3205_s6 = scalar_lea.hbm %s4111_s12, 128 }
  0xe8   : > { %p3206_p2 = scmp.ne.s32.totalorder %s4111_s12, %s3205_s6  ;;  %p3212_p8 = scmp.lt.u32.totalorder %s3205_s6, %s4111_s12 }
  0xea   : > { %p3208_p6 = pnand %p3206_p2, %p4173_p3 }
  0xec   : > { %p3209_p0 = pneg %p3208_p6 }
  0xee   : > { %p3214_p4 = pnand %p3212_p8, %p3209_p0 }
  0xf0   : > { %3217 = shalt.err (!%p3214_p4)
}
  0xf1   : > { %s3218_s18 = scalar_lea.vmem %s494_s22, 128  ;;  %p3226_p13 = scmp.lt.s32.totalorder %s494_s22, %s494_s22 }
  0xf2   : > { %p3219_p10 = scmp.ne.s32.totalorder %s494_s22, %s3218_s18  ;;  %p3227_p5 = scmp.lt.s32.totalorder %s3218_s18, %s3218_s18 }
  0xf4   : > { %p3221_p7 = pnand %p3219_p10, %p4173_p3  ;;  %p3228_p9 = por %p3227_p5, %p3226_p13 }
  0xf6   : > { %p3222_p12 = pneg %p3221_p7 }
  0xf8   : > { %p3229_p11 = pnand %p3228_p9, %p3222_p12 }
  0xfa   : > { %3232 = shalt.err (!%p3229_p11)
}
  0xfb   : > { %2901 = dma.hbm_to_vmem [thread:$0]  (!%p4174_p1), %s4111_s12, 128, %s494_s22, [#allocation19]  }
  0xfc   : > { %s3772_s21 = scalar_lea.hbm %s4099_s0, %s3644_s9  ;;  %s514_s5 = scalar_lea.vmem [#allocation3], %s3641_s4 }
  0xfd   : > { %s521_s28 = sshll.u32 %s514_s5, 4  ;;  %s3781_s27 = scalar_lea.hbm %s4101_s2, %s3644_s9  ;;  %s3775_s28 = int_to_ptr.vmem [resolvable:$true] %s521_s28 }
  0xfe   : > { %s4177_s6 = sand.u32 1, %s3375_s20   ;;  %s3233_s25 = scalar_lea.hbm %s3772_s21, 128 }
  0xff   : > { %s511_s22 = scalar_lea.sflag [#allocation4], %s4177_s6  ;;  %p3234_p3 = scmp.ne.s32.totalorder %s3772_s21, %s3233_s25 }
 0x100   : > { %p4178_p1 = scmp.ne.s32.totalorder %s4171_s8, 0  ;;  %s3238_s15 = scalar_lea.hbm %s4099_s0, 256 }
 0x101   : > { %p3239_p0 = scmp.lt.u32.totalorder %s3772_s21, %s4099_s0  ;;  %p3240_p8 = scmp.lt.u32.totalorder %s3238_s15, %s3233_s25 }
 0x102   : > { %p3236_p2 = pnand %p3234_p3, %p4178_p1  ;;  %p3242_p10 = scmp.lt.u32.totalorder %s3233_s25, %s3772_s21 }
 0x103   : > { %p3241_p4 = por %p3240_p8, %p3239_p0 }
 0x104   : > { %p3237_p6 = pneg %p3236_p2 }
 0x105   : > { %p3243_p7 = por %p3242_p10, %p3241_p4 }
 0x107   : > { %p3244_p12 = pnand %p3243_p7, %p3237_p6 }
 0x109   : > { %3247 = shalt.err (!%p3244_p12)
}
 0x10a   : > { %s3248_s9 = scalar_lea.vmem %s3775_s28, 128  ;;  %s3391_s29 = smov [#allocation3]  }
 0x10b   : > { %p3249_p13 = scmp.ne.s32.totalorder %s3775_s28, %s3248_s9  ;;  %s3253_s1 = sshll.u32 %s3391_s29, 4  ;;  %s3254_s1 = int_to_ptr.vmem [resolvable:$false] %s3253_s1 }
 0x10c   : > { %s3255_s26 = scalar_lea.vmem %s3254_s1, 256  ;;  %p3256_p11 = scmp.lt.s32.totalorder %s3775_s28, %s3254_s1 }
 0x10d   : > { %p3251_p5 = pnand %p3249_p13, %p4178_p1  ;;  %p3257_p3 = scmp.lt.s32.totalorder %s3255_s26, %s3248_s9 }
 0x10f   : > { %p3252_p9 = pneg %p3251_p5  ;;  %p3258_p2 = por %p3257_p3, %p3256_p11 }
 0x111   : > { %p3259_p0 = pnand %p3258_p2, %p3252_p9 }
 0x113   : > { %3262 = shalt.err (!%p3259_p0)
}
 0x114   : > { %p4179_p6 = scmp.ne.s32.totalorder %s4169_s11, 0  ;;  %s550_s5 = scalar_lea.vmem [#allocation8], %s3641_s4 }
 0x115   : > { %s557_s13 = sshll.u32 %s550_s5, 4  ;;  %s3263_s14 = scalar_lea.hbm %s3781_s27, 128  ;;  %s558_s13 = int_to_ptr.vmem [resolvable:$true] %s557_s13 }
 0x116   : > { %2905 = dma.hbm_to_vmem [thread:$0]  (!%p4179_p6), %s3772_s21, 128, %s3775_s28, %s511_s22  }
 0x117   : > { %p3264_p8 = scmp.ne.s32.totalorder %s3781_s27, %s3263_s14  ;;  %s3268_s17 = scalar_lea.hbm %s4101_s2, 256 }
 0x118   : > { %p3269_p7 = scmp.lt.u32.totalorder %s3781_s27, %s4101_s2  ;;  %p3270_p12 = scmp.lt.u32.totalorder %s3268_s17, %s3263_s14 }
 0x119   : > { %p3266_p4 = pnand %p3264_p8, %p4178_p1  ;;  %p3272_p5 = scmp.lt.u32.totalorder %s3263_s14, %s3781_s27 }
 0x11a   : > { %p3271_p13 = por %p3270_p12, %p3269_p7 }
 0x11b   : > { %p3267_p10 = pneg %p3266_p4 }
 0x11c   : > { %p3273_p9 = por %p3272_p5, %p3271_p13 }
 0x11e   : > { %p3274_p11 = pnand %p3273_p9, %p3267_p10 }
 0x120   : > { %3277 = shalt.err (!%p3274_p11)
}
 0x121   : > { %s3278_s4 = scalar_lea.vmem %s558_s13, 128  ;;  %s3392_s21 = smov [#allocation8]  }
 0x122   : > { %p3279_p3 = scmp.ne.s32.totalorder %s558_s13, %s3278_s4  ;;  %s3283_s28 = sshll.u32 %s3392_s21, 4  ;;  %s3284_s28 = int_to_ptr.vmem [resolvable:$false] %s3283_s28 }
 0x123   : > { %s3285_s22 = scalar_lea.vmem %s3284_s28, 256  ;;  %p3286_p8 = scmp.lt.s32.totalorder %s558_s13, %s3284_s28 }
 0x124   : > { %p3281_p2 = pnand %p3279_p3, %p4178_p1  ;;  %p3287_p4 = scmp.lt.s32.totalorder %s3285_s22, %s3278_s4 }
 0x126   : > { %p3282_p0 = pneg %p3281_p2  ;;  %p3288_p6 = por %p3287_p4, %p3286_p8 }
 0x128   : > { %p3289_p7 = pnand %p3288_p6, %p3282_p0 }
 0x12a   : > { %3292 = shalt.err (!%p3289_p7)
}
 0x12b   : > { %p4180_p12 = scmp.ne.s32.totalorder %s4169_s11, 0  ;;  %s4181_s18 = sld [smem:[#allocation30_spill]] }
 0x12d   : > { %2911 = dma.hbm_to_vmem [thread:$0]  (!%p4180_p12), %s3781_s27, 128, %s558_s13, %s3660_s3  }
 0x131   : > { %p4182_p10 = scmp.ne.s32.totalorder %s4181_s18, 0 }
 0x132   : > { %s3828_s8 = sand.u32 (!%p4182_p10), 1, %s3371_s19   ;;  %p4183_p1 = scmp.ne.s32.totalorder (!%p4182_p10), %s4164_s30, 0 }
 0x133   : > { %566 = sbr.rel (%p4182_p10) target bundleno = 2281 (0x8e9), region = 80  ;;  %s3831_s23 = sshll.u32 (!%p4182_p10), %s3828_s8, 3 }
 0x134   : > { %s569_s9 = scalar_lea.sflag (!%p4182_p10), [#allocation4], %s3828_s8  ;;  %s572_s29 = scalar_lea.vmem (!%p4182_p10), [#allocation3], %s3831_s23 }
 0x13a   : > { %3338 = dma.done.wait (%p4183_p1), %s569_s9, 128  }
 0x13b   : > { %3340 = vsyncadd (%p4183_p1), %s569_s9, 4294967168  ;;  %s577_s3 = sand.u32 1, %s3503_s24   ;;  %s581_s27 = scalar_lea.vmem [#allocation6], %s3831_s23 }
 0x13c   : > { %s578_s11 = scalar_lea.sflag [#allocation7], %s577_s3 }
 0x13d   : > { %3342 = dma.done.wait (%p4183_p1), %s578_s11, 256  }
 0x13e   : > { %3344 = vsyncadd (%p4183_p1), %s578_s11, 4294967040  ;;  %s590_s1 = scalar_lea.vmem [#allocation8], %s3831_s23  ;;  %p4184_p6 = scmp.eq.s32.totalorder %s3503_s24, 0 }
 0x140   : > { %3346 = dma.done.wait (%p4184_p6), [#allocation10], 1024   ;;  %p4185_p13 = pmov %p4184_p6 }
 0x141   : > { %p4186_p5 = pmov %p4184_p6 }
 0x142   : > { %3348 = vsyncadd (%p4185_p13), [#allocation10], 4294966272 }
 0x143   : > { %3350 = dma.done.wait (%p4186_p5), [#allocation13], 528   ;;  %p4187_p9 = pmov %p4186_p5 }
 0x144   : > { %p4188_p11 = pmov %p4186_p5 }
 0x145   : > { %3352 = vsyncadd (%p4187_p9), [#allocation13], 4294966768 }
 0x146   : > { %3354 = dma.done.wait (%p4188_p11), [#allocation16], 32   ;;  %p4189_p3 = pmov %p4186_p5 }
 0x148   : > { %3356 = vsyncadd (%p4189_p3), [#allocation16], 4294967264  ;;  %p4190_p2 = pmov %p4189_p3 }
 0x14a   : > { %3358 = dma.done.wait (%p4190_p2), [#allocation19], 128   ;;  %p4191_p0 = pmov %p4190_p2 }
 0x14b   : > { %v3393_v0 = vmov 0.0|0.0   ;;  %vm3394_vm0 = vmmov 0   ;;  %v3395_v1 = vmov 0.0   ;;  %v764_v2 = vld [vmem:[#allocation11] sm:$0xff]  ;;  %v765_v3 = vld [vmem:[#allocation11 + $0x8] sm:$0xff]  ;;  %v766_v7 = vld [vmem:[#allocation11 + $0x10] sm:$0xff] }
 0x14c   : > { %3360 = vsyncadd (%p4191_p0), [#allocation19], 4294967168  ;;  %2818 = vmatprep.subr.bf16.mxu1 %v3393_v0  ;;  %2812 = vmatprep.subr.bf16.mxu0 %v3393_v0  ;;  %v676_v4 = vld [vmem:[#allocation9] sm:$0xff]  ;;  %v2819_v5 = vpack.c.bf16 %v765_v3, %v764_v2  ;;  %v677_v6 = vld [vmem:[#allocation9 + $0x8] sm:$0xff]  ;;  %s4192_s5 = sld [smem:[#allocation42_spill]]  ;;  %s3396_s13 = smov 120  }
 0x14d   : > { %2707 = vmatprep.mubr.msk.f32.mxu1 %vm3394_vm0, %v3395_v1  ;;  %2696 = vmatprep.mubr.msk.f32.mxu0 %vm3394_vm0, %v3395_v1  ;;  %v767_v8 = vld [vmem:[#allocation11 + $0x18] sm:$0xff]  ;;  %v2813_v9 = vpack.c.bf16 %v677_v6, %v676_v4  ;;  %v678_v10 = vld [vmem:[#allocation9 + $0x10] sm:$0xff]  ;;  %vm687_vm1 = vcmask 261120   ;;  %v762_v15 = vld [vmem:[%s581_s27] sm:$0xff]  ;;  %s4193_s25 = sld [smem:[#allocation37_spill]]  ;;  %vm934_vm2 = vcmask 64512  }
 0x14e   : > { %v679_v11 = vld [vmem:[#allocation9 + $0x18] sm:$0xff]  ;;  %2820 = vmatpush3.bf16.msra.mxu1 %v2819_v5  ;;  %v2822_v12 = vpack.c.bf16 %v767_v8, %v766_v7  ;;  %v2600_v17 = vld [vmem:[#allocation12] ss:$0 sm:$0xff]  ;;  %s3397_s17 = smov 112   ;;  %s3398_s16 = smov 104   ;;  %v848_v26 = vld [vmem:[#allocation14] sm:$0xff] }
 0x14f   : > { %2814 = vmatpush3.bf16.msra.mxu0 %v2813_v9  ;;  %2821 = vmatprep.subr.bf16.mxu1 %v3393_v0  ;;  %v2816_v14 = vpack.c.bf16 %v679_v11, %v678_v10  ;;  %v3878_v16 = vld [vmem:[%s572_s29] sm:$0xff]  ;;  %s3399_s15 = smov 8   ;;  %vm1589_vm3 = vcmask 130048   ;;  %s4194_s28 = sld [smem:[#allocation41_spill]]  ;;  %vm2256_vm4 = vcmask 261248  }
 0x150   : > { %2815 = vmatprep.subr.bf16.mxu0 %v3393_v0  ;;  %v849_v27 = vld [vmem:[#allocation14 + $0x8] sm:$0xff]  ;;  %v850_v28 = vld [vmem:[#allocation14 + $0x10] sm:$0xff]  ;;  %v851_v30 = vld [vmem:[#allocation14 + $0x18] sm:$0xff]  ;;  %s3400_s27 = smov 16   ;;  %s4197_s6 = sld [smem:[#allocation44_spill]] }
 0x151   : > { %v2825_v29 = vpack.c.bf16 %v849_v27, %v848_v26  ;;  %v2828_v31 = vpack.c.bf16 %v851_v30, %v850_v28  ;;  %v763_v32 = vld [vmem:[%s590_s1] sm:$0xff]  ;;  %s4195_s1 = sld [smem:[#allocation33_spill]]  ;;  %s4198_s21 = sld [smem:[#allocation45_spill]] }
 0x152   : > { %v932_v13 = vld [vmem:[%s4192_s5] sm:$0xff]  ;;  %2823 = vmatpush3.bf16.msra.mxu1 %v2822_v12  ;;  %s4196_s5 = sld [smem:[#allocation43_spill]]  ;;  %s2377_s9 = scalar_lea.sflag [#allocation5], %s3828_s8 }
 0x153   : > { %1332 = vrot.lane.b32.xlu1 %v932_v13, %s3396_s13  ;;  %2817 = vmatpush3.bf16.msra.mxu0 %v2816_v14  ;;  %v2598_v18 = vld [vmem:[%s4193_s25] ss:$0 sm:$0xff]  ;;  %s2633_s25 = sshll.u32 %s3503_s24, 7  ;;  %s3401_s24 = smov [#allocation20]  }
 0x154   : > { %2721 = vmatprep.subr.mxu1 %v3395_v1  ;;  %2824 = vmatprep.subr.bf16.mxu0 %v3393_v0 }
 0x155   : > { %2708 = vmatmul.mubr.msk.f32.vlgmr.msra.gmra.mrb[0].mxu1 %vm687_vm1, %v762_v15 }
 0x156   : > { %2697 = vmatmul.mubr.msk.f32.vlgmr.msra.gmra.mrb[0].mxu0 %vm687_vm1, %v3878_v16  ;;  %2723 = vmatprep.mubr.msk.f32.mxu1 %vm3394_vm0, %v3395_v1 }
 0x157   : > { %2718 = vmatprep.mubr.msk.f32.mxu0 %vm3394_vm0, %v3395_v1  ;;  %2826 = vmatpush3.bf16.msra.mxu0 %v2825_v29  ;;  %s4199_s22 = smov %s4198_s21  ;;  %s4054_s18 = scalar_lea.hbm %s4198_s21, %s2633_s25 }
 0x158   : > { %2827 = vmatprep.subr.bf16.mxu0 %v3393_v0  ;;  %p4200_p4 = scmp.ne.s32.totalorder %s4195_s1, 0 }
 0x15b   : > { %2829 = vmatpush3.bf16.msra.mxu0 %v2828_v31 }
 0x15c   : > { %2731 = vmatprep.subr.mxu0 %v3395_v1 }
 0x15e   : > { %2719 = vmatmul.mubr.msk.f32.vlgmr.msra.gmra.mrb[2].mxu0 %vm687_vm1, %v763_v32 }
 0x15f   : > { %2733 = vmatprep.mubr.msk.f32.mxu0 %vm3394_vm0, %v3395_v1 }
 0x1c5   : > { %v1333_v34 = vpop.permute.xlu1 %1332 }
 0x228   : > { %v844_v19 = vpop.f32.mrb[0].mxu1 }
 0x229   : > { %v845_v20 = vadd.f32 %v2600_v17, %v844_v19  ;;  %v757_v21 = vpop.f32.mrb[0].mxu0  ;;  %v2709_v22 = vpop.f32.mrb[1].mxu1 }
 0x22a   : > { %v758_v23 = vadd.f32 %v2598_v18, %v757_v21  ;;  %v2698_v24 = vpop.f32.mrb[1].mxu0  ;;  %v3966_v18 = vld [vmem:[#allocation18] sm:$0xff] }
 0x22b   : > { %1593 = vrot.lane.b32.xlu1 %v845_v20, %s3397_s17  ;;  %1256 = vrot.lane.b32.xlu0 %v845_v20, %s3396_s13 }
 0x22c   : > { %v761_v25 = vmul.f32 0.35355338, %v758_v23  ;;  %2722 = vmatpush3.xpose.msk.msra.mxu1 %vm934_vm2, %v845_v20  ;;  %2732 = vmatpush3.msra.mxu0 %v3966_v18 }
 0x22d   : > { %2726 = vmatprep.subr.mxu1 %v3395_v1  ;;  %2736 = vmatprep.subr.mxu0 %v3395_v1 }
 0x22f   : > { %2724 = vmatmul.mubr.msk.f32.vlgmr.msra.gmra.mrb[2].mxu1 %vm934_vm2, %v761_v25  ;;  %1669 = vrot.lane.b32.xlu1 %v932_v13, %s3397_s17 }
 0x230   : > { %1254 = vrot.lane.b32.xlu0 %v761_v25, %s3396_s13  ;;  %2727 = vmatpush3.xpose.msk.msra.mxu1 %vm934_vm2, %v932_v13 }
 0x231   : > { %2728 = vmatprep.mubr.msk.f32.mxu1 %vm3394_vm0, %v3395_v1  ;;  %2741 = vmatprep.subr.mxu1 %v3395_v1  ;;  %v928_v11 = vpop.f32.mrb[2].mxu0 }
 0x232   : > { %v2720_v12 = vpop.f32.mrb[3].mxu0 }
 0x233   : > { %2729 = vmatmul.mubr.msk.f32.vlgmr.msra.gmra.mrb[4].mxu1 %vm934_vm2, %v761_v25  ;;  %1919 = vrot.lane.b32.xlu1 %v761_v25, %s3398_s16 }
 0x234   : > { %1591 = vrot.lane.b32.xlu0 %v761_v25, %s3397_s17  ;;  %2743 = vmatprep.mubr.msk.f32.mxu1 %vm3394_vm0, %v3395_v1 }
 0x238   : > { %1921 = vrot.lane.b32.xlu0 %v845_v20, %s3398_s16 }
 0x23c   : > { %1997 = vrot.lane.b32.xlu0 %v932_v13, %s3398_s16 }
 0x29d   : > { %v1257_v33 = vpop.permute.xlu0 %1256  ;;  %v1594_v36 = vpop.permute.xlu1 %1593 }
 0x29e   : > { %2742 = vmatpush3.xpose.msk.msra.mxu1 %vm934_vm2, %v1257_v33 }
 0x29f   : > { %2746 = vmatprep.subr.mxu1 %v3395_v1 }
 0x2a1   : > { %v1670_v38 = vpop.permute.xlu1 %1669 }
 0x2a2   : > { %v1255_v35 = vpop.permute.xlu0 %1254 }
 0x2a3   : > { %2744 = vmatmul.mubr.msk.f32.vlgmr.msra.gmra.mrb[6].mxu1 %vm934_vm2, %v1255_v35 }
 0x2a4   : > { %2747 = vmatpush3.xpose.msk.msra.mxu1 %vm934_vm2, %v1333_v34  ;;  %2748 = vmatprep.mubr.msk.f32.mxu1 %vm3394_vm0, %v3395_v1 }
 0x2a5   : > { %2761 = vmatprep.subr.mxu1 %v3395_v1  ;;  %v1920_v41 = vpop.permute.xlu1 %1919 }
 0x2a6   : > { %v1592_v37 = vpop.permute.xlu0 %1591 }
 0x2a7   : > { %2749 = vmatmul.mubr.msk.f32.vlgmr.msra.gmra.mrb[8].mxu1 %vm934_vm2, %v1255_v35 }
 0x2a8   : > { %2762 = vmatpush3.xpose.msk.msra.mxu1 %vm934_vm2, %v1594_v36  ;;  %2763 = vmatprep.mubr.msk.f32.mxu1 %vm3394_vm0, %v3395_v1 }
 0x2a9   : > { %2766 = vmatprep.subr.mxu1 %v3395_v1 }
 0x2aa   : > { %v1922_v39 = vpop.permute.xlu0 %1921 }
 0x2ab   : > { %2764 = vmatmul.mubr.msk.f32.vlgmr.msra.gmra.mrb[10].mxu1 %vm934_vm2, %v1592_v37 }
 0x2ac   : > { %2767 = vmatpush3.xpose.msk.msra.mxu1 %vm934_vm2, %v1670_v38  ;;  %2768 = vmatprep.mubr.msk.f32.mxu1 %vm3394_vm0, %v3395_v1 }
 0x2ad   : > { %2781 = vmatprep.subr.mxu1 %v3395_v1 }
 0x2ae   : > { %v1998_v40 = vpop.permute.xlu0 %1997 }
 0x2af   : > { %2769 = vmatmul.mubr.msk.f32.vlgmr.msra.gmra.mrb[12].mxu1 %vm934_vm2, %v1592_v37  ;;  %v2602_v37 = vld [vmem:[#allocation15] ss:$0 sm:$0xff] }
 0x2b0   : > { %2782 = vmatpush3.xpose.msk.msra.mxu1 %vm934_vm2, %v1922_v39  ;;  %2783 = vmatprep.mubr.msk.f32.mxu1 %vm3394_vm0, %v3395_v1  ;;  %v929_v38 = vadd.f32 %v2602_v37, %v928_v11 }
 0x2b1   : > { %2786 = vmatprep.subr.mxu1 %v3395_v1 }
 0x2b3   : > { %2784 = vmatmul.mubr.msk.f32.vlgmr.msra.gmra.mrb[14].mxu1 %vm934_vm2, %v1920_v41 }
 0x2b4   : > { %2787 = vmatpush3.xpose.msk.msra.mxu1 %vm934_vm2, %v1998_v40  ;;  %2788 = vmatprep.mubr.msk.f32.mxu1 %vm3394_vm0, %v3395_v1 }
 0x2b5   : > { %2830 = vmatprep.subr.bf16.mxu1 %v3393_v0 }
 0x2b7   : > { %2789 = vmatmul.mubr.msk.f32.vlgmr.msra.gmra.mrb[16].mxu1 %vm934_vm2, %v1920_v41 }
 0x2b8   : > { %2809 = vmatprep.mubr.msk.f32.mxu1 %vm3394_vm0, %v3395_v1 }
 0x302   : > { %v1007_v42 = vpop.f32.mrb[2].mxu1 }
 0x303   : > { %v2725_v43 = vpop.f32.mrb[3].mxu1  ;;  %v1084_v44 = vsel %vm934_vm2, %v1007_v42, -inf }
 0x304   : > { %1085 = vmax.xlane.f32.xlu1 %v1084_v44 }
 0x306   : > { %v1080_v45 = vpop.f32.mrb[4].mxu1 }
 0x307   : > { %v2730_v46 = vpop.f32.mrb[5].mxu1  ;;  %v1087_v47 = vsel %vm934_vm2, %v1080_v45, -inf }
 0x308   : > { %1088 = vmax.xlane.f32.xlu0 %v1087_v47 }
 0x376   : > { %v1328_v48 = vpop.f32.mrb[6].mxu1 }
 0x377   : > { %v2745_v49 = vpop.f32.mrb[7].mxu1  ;;  %v1406_v50 = vsel %vm934_vm2, %v1328_v48, -inf }
 0x378   : > { %1407 = vmax.xlane.f32.xlu0 %v1406_v50 }
 0x37a   : > { %v1402_v51 = vpop.f32.mrb[8].mxu1 }
 0x37b   : > { %v2750_v52 = vpop.f32.mrb[9].mxu1  ;;  %v1409_v53 = vsel %vm934_vm2, %v1402_v51, -inf }
 0x37c   : > { %1410 = vmax.xlane.f32.xlu1 %v1409_v53 }
 0x37e   : > { %v1665_v54 = vpop.f32.mrb[10].mxu1 }
 0x37f   : > { %v2765_v55 = vpop.f32.mrb[11].mxu1  ;;  %v1743_v56 = vsel %vm934_vm2, %v1665_v54, -inf }
 0x380   : > { %1744 = vmax.xlane.f32.xlu0 %v1743_v56 }
 0x382   : > { %v3952_v57 = vpop.f32.mrb[12].mxu1 }
 0x383   : > { %v2770_v58 = vpop.f32.mrb[13].mxu1  ;;  %v1746_v59 = vsel %vm934_vm2, %v3952_v57, -inf }
 0x384   : > { %1747 = vmax.xlane.f32.xlu1 %v1746_v59 }
 0x386   : > { %v3956_v60 = vpop.f32.mrb[14].mxu1 }
 0x387   : > { %v2785_v61 = vpop.f32.mrb[15].mxu1  ;;  %v2071_v62 = vsel %vm934_vm2, %v3956_v60, -inf }
 0x388   : > { %2072 = vmax.xlane.f32.xlu0 %v2071_v62 }
 0x38a   : > { %v3960_v63 = vpop.f32.mrb[16].mxu1 }
 0x38b   : > { %v2790_v2 = vpop.f32.mrb[17].mxu1  ;;  %v2074_v3 = vsel %vm934_vm2, %v3960_v63, -inf }
 0x38c   : > { %2075 = vmax.xlane.f32.xlu1 %v2074_v3 }
 0x391   : > { %v1086_v4 = vpop.xlane.xlu1 %1085 }
 0x395   : > { %v1089_v5 = vpop.xlane.xlu0 %1088 }
 0x396   : > { %v1090_v6 = vmax.f32 %v1086_v4, %v1089_v5 }
 0x398   : > { %v1091_v7 = vsub.f32 %v1007_v42, %v1090_v6  ;;  %v1094_v8 = vsub.f32 %v1080_v45, %v1090_v6 }
 0x39a   : > { %v1092_v9 = vmul.f32 1.442695, %v1091_v7  ;;  %v1095_v10 = vmul.f32 1.442695, %v1094_v8 }
 0x39c   : > { %2981 = vpow2.f32 %v1092_v9 }
 0x39d   : > { %2983 = vpow2.f32 %v1095_v10 }
 0x3a6   : > { %v2982_v13 = vpop.eup %2981 }
 0x3a7   : > { %v2984_v14 = vpop.eup %2983  ;;  %v1097_v15 = vsel %vm934_vm2, %v2982_v13, 0.0 }
 0x3a8   : > { %1098 = vadd.xlane.f32.xlu0 %v1097_v15  ;;  %v1100_v17 = vsel %vm934_vm2, %v2984_v14, 0.0 }
 0x3a9   : > { %1101 = vadd.xlane.f32.xlu1 %v1100_v17 }
 0x405   : > { %v1408_v19 = vpop.xlane.xlu0 %1407 }
 0x409   : > { %v1411_v20 = vpop.xlane.xlu1 %1410 }
 0x40a   : > { %v1412_v21 = vmax.f32 %v1408_v19, %v1411_v20 }
 0x40c   : > { %v1413_v22 = vsub.f32 %v1328_v48, %v1412_v21  ;;  %v1416_v23 = vsub.f32 %v1402_v51, %v1412_v21 }
 0x40d   : > { %v1745_v26 = vpop.xlane.xlu0 %1744 }
 0x40e   : > { %v1414_v24 = vmul.f32 1.442695, %v1413_v22  ;;  %v1417_v25 = vmul.f32 1.442695, %v1416_v23 }
 0x410   : > { %2985 = vpow2.f32 %v1414_v24 }
 0x411   : > { %2987 = vpow2.f32 %v1417_v25  ;;  %v1748_v27 = vpop.xlane.xlu1 %1747 }
 0x412   : > { %v1749_v28 = vmax.f32 %v1745_v26, %v1748_v27 }
 0x414   : > { %v1750_v29 = vsub.f32 %v1665_v54, %v1749_v28  ;;  %v1753_v45 = vsub.f32 %v3952_v57, %v1749_v28 }
 0x415   : > { %v2073_v39 = vpop.xlane.xlu0 %2072 }
 0x416   : > { %v1751_v30 = vmul.f32 1.442695, %v1750_v29  ;;  %v1754_v48 = vmul.f32 1.442695, %v1753_v45 }
 0x418   : > { %2989 = vpow2.f32 %v1751_v30 }
 0x419   : > { %v2076_v40 = vpop.xlane.xlu1 %2075 }
 0x41a   : > { %v3970_v31 = vpop.eup %2985  ;;  %v2077_v44 = vmax.f32 %v2073_v39, %v2076_v40 }
 0x41b   : > { %v2988_v32 = vpop.eup %2987  ;;  %v1419_v33 = vsel %vm934_vm2, %v3970_v31, 0.0 }
 0x41c   : > { %1420 = vadd.xlane.f32.xlu0 %v1419_v33  ;;  %v1422_v34 = vsel %vm934_vm2, %v2988_v32, 0.0  ;;  %v2078_v47 = vsub.f32 %v3956_v60, %v2077_v44  ;;  %v2081_v49 = vsub.f32 %v3960_v63, %v2077_v44  ;;  %v2260_v33 = vld [vmem:[%s4194_s28 + $0x8] sm:$0xff] }
 0x41d   : > { %1423 = vadd.xlane.f32.xlu1 %v1422_v34 }
 0x41e   : > { %v2079_v51 = vmul.f32 1.442695, %v2078_v47  ;;  %v2082_v52 = vmul.f32 1.442695, %v2081_v49 }
 0x422   : > { %v3975_v35 = vpop.eup %2989 }
 0x423   : > { %v1756_v36 = vsel %vm934_vm2, %v3975_v35, 0.0 }
 0x424   : > { %1757 = vadd.xlane.f32.xlu0 %v1756_v36  ;;  %v2262_v36 = vld [vmem:[%s4194_s28 + $0x18] sm:$0xff] }
 0x42e   : > { %1508 = vrot.lane.b32.xlu1 %v929_v38, %s3396_s13 }
 0x432   : > { %1767 = vrot.lane.b32.xlu1 %v3966_v18, %s3397_s17 }
 0x435   : > { %v1099_v41 = vpop.xlane.xlu0 %1098 }
 0x436   : > { %v1102_v42 = vpop.xlane.xlu1 %1101 }
 0x437   : > { %v1103_v43 = vadd.f32 %v1102_v42, %v1099_v41  ;;  %v2628_v42 = vld [vmem:[#allocation17] ss:$0 sm:$0xff] }
 0x439   : > { %2991 = vrcp.f32 %v1103_v43 }
 0x43a   : > { %1431 = vrot.lane.b32.xlu0 %v3966_v18, %s3396_s13  ;;  %2993 = vpow2.f32 %v1754_v48 }
 0x43b   : > { %2995 = vpow2.f32 %v2079_v51 }
 0x43c   : > { %2997 = vpow2.f32 %v2082_v52 }
 0x443   : > { %v2992_v46 = vpop.eup %2991 }
 0x444   : > { %v1107_v50 = vmul.f32 %v2992_v46, %v2984_v14  ;;  %v1106_v53 = vmul.f32 %v2992_v46, %v2982_v13  ;;  %v2994_v54 = vpop.eup %2993 }
 0x445   : > { %v2996_v55 = vpop.eup %2995  ;;  %v1759_v56 = vsel %vm934_vm2, %v2994_v54, 0.0 }
 0x446   : > { %2734 = vmatmul.mubr.msk.f32.vlgmr.msra.gmra.mrb[4].mxu0 %vm934_vm2, %v1107_v50  ;;  %v2998_v57 = vpop.eup %2997  ;;  %v2084_v58 = vsel %vm934_vm2, %v2996_v55, 0.0 }
 0x447   : > { %2737 = vmatpush3.msra.mxu0 %v929_v38  ;;  %2738 = vmatprep.mubr.msk.f32.mxu0 %vm3394_vm0, %v3395_v1  ;;  %v2087_v59 = vsel %vm934_vm2, %v2998_v57, 0.0 }
 0x448   : > { %2751 = vmatprep.subr.mxu0 %v3395_v1 }
 0x44e   : > { %2739 = vmatmul.mubr.msk.f32.vlgmr.msra.gmra.mrb[4].mxu0 %vm934_vm2, %v1106_v53 }
 0x44f   : > { %2753 = vmatprep.mubr.msk.f32.mxu0 %vm3394_vm0, %v3395_v1 }
 0x456   : > { %1760 = vadd.xlane.f32.xlu1 %v1759_v56 }
 0x459   : > { %2085 = vadd.xlane.f32.xlu0 %v2084_v58 }
 0x45a   : > { %2088 = vadd.xlane.f32.xlu1 %v2087_v59 }
 0x46b   : > { %2095 = vrot.lane.b32.xlu1 %v3966_v18, %s3398_s16 }
 0x46f   : > { %1843 = vrot.lane.b32.xlu0 %v929_v38, %s3397_s17  ;;  %s674_s17 = scalar_lea.vmem [#allocation20], %s3831_s23  ;;  %s3297_s23 = sshll.u32 %s3401_s24, 4  ;;  %s3298_s23 = int_to_ptr.vmem [resolvable:$false] %s3297_s23 }
 0x470   : > { %s3299_s3 = scalar_lea.vmem %s3298_s23, 256 }
 0x473   : > { %2171 = vrot.lane.b32.xlu0 %v929_v38, %s3398_s16  ;;  %s2390_s16 = sshll.u32 %s674_s17, 4  ;;  %s4056_s16 = int_to_ptr.vmem [resolvable:$true] %s2390_s16 }
 0x474   : > { %s3293_s29 = scalar_lea.vmem %s4056_s16, 128  ;;  %p3300_p10 = scmp.lt.s32.totalorder %s4056_s16, %s3298_s23 }
 0x475   : > { %p3294_p8 = scmp.ne.s32.totalorder %s4056_s16, %s3293_s29  ;;  %p3301_p1 = scmp.lt.s32.totalorder %s3299_s3, %s3293_s29 }
 0x477   : > { %p3295_p7 = pnand %p3294_p8, %p4200_p4  ;;  %p3302_p6 = por %p3301_p1, %p3300_p10 }
 0x479   : > { %p3296_p12 = pneg %p3295_p7 }
 0x47b   : > { %p3303_p13 = pnand %p3302_p6, %p3296_p12 }
 0x4a9   : > { %v1421_v60 = vpop.xlane.xlu0 %1420 }
 0x4aa   : > { %v1424_v61 = vpop.xlane.xlu1 %1423 }
 0x4ab   : > { %v1425_v62 = vadd.f32 %v1424_v61, %v1421_v60 }
 0x4ad   : > { %2999 = vrcp.f32 %v1425_v62 }
 0x4ae   : > { %v1509_v5 = vpop.permute.xlu1 %1508 }
 0x4b1   : > { %v1758_v63 = vpop.xlane.xlu0 %1757 }
 0x4b2   : > { %v1768_v7 = vpop.permute.xlu1 %1767 }
 0x4b5   : > { %v1432_v2 = vpop.permute.xlu0 %1431 }
 0x4b6   : > { %2752 = vmatpush3.msra.mxu0 %v1432_v2 }
 0x4b7   : > { %v3000_v3 = vpop.eup %2999  ;;  %2756 = vmatprep.subr.mxu0 %v3395_v1 }
 0x4b8   : > { %v1429_v4 = vmul.f32 %v3000_v3, %v2988_v32  ;;  %v1428_v6 = vmul.f32 %v3000_v3, %v3970_v31 }
 0x4ba   : > { %2754 = vmatmul.mubr.msk.f32.vlgmr.msra.gmra.mrb[6].mxu0 %vm934_vm2, %v1429_v4 }
 0x4bb   : > { %2757 = vmatpush3.msra.mxu0 %v1509_v5  ;;  %2758 = vmatprep.mubr.msk.f32.mxu0 %vm3394_vm0, %v3395_v1 }
 0x4bc   : > { %2771 = vmatprep.subr.mxu0 %v3395_v1 }
 0x4c2   : > { %2759 = vmatmul.mubr.msk.f32.vlgmr.msra.gmra.mrb[6].mxu0 %vm934_vm2, %v1428_v6 }
 0x4c3   : > { %2772 = vmatpush3.msra.mxu0 %v1768_v7  ;;  %2773 = vmatprep.mubr.msk.f32.mxu0 %vm3394_vm0, %v3395_v1 }
 0x4c4   : > { %2776 = vmatprep.subr.mxu0 %v3395_v1 }
 0x4e3   : > { %v1761_v8 = vpop.xlane.xlu1 %1760 }
 0x4e4   : > { %v1762_v9 = vadd.f32 %v1761_v8, %v1758_v63 }
 0x4e6   : > { %3001 = vrcp.f32 %v1762_v9  ;;  %v2086_v10 = vpop.xlane.xlu0 %2085 }
 0x4e7   : > { %v2089_v11 = vpop.xlane.xlu1 %2088 }
 0x4e8   : > { %v2090_v12 = vadd.f32 %v2089_v11, %v2086_v10 }
 0x4ea   : > { %3003 = vrcp.f32 %v2090_v12  ;;  %v1844_v15 = vpop.permute.xlu0 %1843 }
 0x4eb   : > { %v2096_v17 = vpop.permute.xlu1 %2095 }
 0x4ee   : > { %v2172_v21 = vpop.permute.xlu0 %2171 }
 0x4f0   : > { %v3002_v13 = vpop.eup %3001 }
 0x4f1   : > { %v1766_v14 = vmul.f32 %v3002_v13, %v2994_v54  ;;  %v1765_v18 = vmul.f32 %v3002_v13, %v3975_v35  ;;  %v2261_v35 = vld [vmem:[%s4194_s28 + $0x10] sm:$0xff] }
 0x4f2   : > { %v2834_v37 = vpack.c.bf16 %v2262_v36, %v2261_v35 }
 0x4f3   : > { %2774 = vmatmul.mubr.msk.f32.vlgmr.msra.gmra.mrb[8].mxu0 %vm934_vm2, %v1766_v14 }
 0x4f4   : > { %2777 = vmatpush3.msra.mxu0 %v1844_v15  ;;  %2778 = vmatprep.mubr.msk.f32.mxu0 %vm3394_vm0, %v3395_v1  ;;  %v3004_v19 = vpop.eup %3003 }
 0x4f5   : > { %2791 = vmatprep.subr.mxu0 %v3395_v1  ;;  %v2094_v20 = vmul.f32 %v3004_v19, %v2998_v57  ;;  %v2093_v22 = vmul.f32 %v3004_v19, %v2996_v55  ;;  %v2631_v57 = vld [vmem:[%s4197_s6] ss:$0 sm:$0xff] }
 0x4fb   : > { %2779 = vmatmul.mubr.msk.f32.vlgmr.msra.gmra.mrb[8].mxu0 %vm934_vm2, %v1765_v18 }
 0x4fc   : > { %2792 = vmatpush3.msra.mxu0 %v2096_v17  ;;  %2793 = vmatprep.mubr.msk.f32.mxu0 %vm3394_vm0, %v3395_v1 }
 0x4fd   : > { %2796 = vmatprep.subr.mxu0 %v3395_v1 }
 0x4ff   : > { %2794 = vmatmul.mubr.msk.f32.vlgmr.msra.gmra.mrb[10].mxu0 %vm934_vm2, %v2094_v20 }
 0x500   : > { %2797 = vmatpush3.msra.mxu0 %v2172_v21  ;;  %2798 = vmatprep.mubr.msk.f32.mxu0 %vm3394_vm0, %v3395_v1  ;;  %v2259_v1 = vld [vmem:[%s4194_s28] sm:$0xff] }
 0x501   : > { %v2831_v34 = vpack.c.bf16 %v2260_v33, %v2259_v1 }
 0x503   : > { %2832 = vmatpush3.bf16.msra.mxu1 %v2831_v34 }
 0x504   : > { %2833 = vmatprep.subr.bf16.mxu1 %v3393_v0 }
 0x507   : > { %2799 = vmatmul.mubr.msk.f32.vlgmr.msra.gmra.mrb[10].mxu0 %vm934_vm2, %v2093_v22  ;;  %2835 = vmatpush3.bf16.msra.mxu1 %v2834_v37 }
 0x521   : > { %v1250_v23 = vpop.f32.mrb[4].mxu0 }
 0x522   : > { %v2740_v24 = vpop.f32.mrb[5].mxu0 }
 0x595   : > { %v1580_v25 = vpop.f32.mrb[6].mxu0 }
 0x596   : > { %1585 = vrot.lane.b32.xlu0 %v1580_v25, %s3399_s15  ;;  %v2760_v26 = vpop.f32.mrb[7].mxu0 }
 0x5ce   : > { %v1915_v27 = vpop.f32.mrb[8].mxu0 }
 0x5cf   : > { %v2780_v28 = vpop.f32.mrb[9].mxu0 }
 0x5da   : > { %v2243_v29 = vpop.f32.mrb[10].mxu0 }
 0x5db   : > { %2248 = vrot.lane.b32.xlu1 %v2243_v29, %s3399_s15  ;;  %v2800_v30 = vpop.f32.mrb[11].mxu0 }
 0x608   : > { %v1586_v31 = vpop.permute.xlu0 %1585 }
 0x609   : > { %v1588_v32 = vsel %vm934_vm2, %v1250_v23, %v1586_v31 }
 0x60a   : > { %1590 = vst.msk [vmem:[#allocation2] sm:$0xff] %vm1589_vm3, %v1588_v32 }
 0x64d   : > { %v2249_v38 = vpop.permute.xlu1 %2248 }
 0x64e   : > { %v2251_v39 = vsel %vm934_vm2, %v1915_v27, %v2249_v38 }
 0x64f   : > { %2253 = vrot.lane.b32.xlu1 %v2251_v39, %s3400_s27 }
 0x6c1   : > { %v2254_v40 = vpop.permute.xlu1 %2253 }
 0x6c2   : > { %2257 = vst.msk [vmem:[#allocation2] sm:$0xff] %vm2256_vm4, %v2254_v40 }
 0x6c9   : > { %v2258_v41 = vld [vmem:[#allocation2] sm:$0xff] }
 0x6ca   : > { %2810 = vmatmul.mubr.msk.f32.vlgmr.msra.gmra.mrb[18].mxu1 %vm687_vm1, %v2258_v41 }
 0x79d   : > { %v2339_v43 = vpop.f32.mrb[18].mxu1 }
 0x79e   : > { %v2340_v44 = vadd.f32 %v2628_v42, %v2339_v43  ;;  %v2811_v45 = vpop.f32.mrb[19].mxu1 }
 0x7a0   : > { %v2344_v46 = vadd.f32 %v2340_v44, %v3878_v16  ;;  %v2630_v16 = vld [vmem:[%s4196_s5] ss:$0 sm:$0xff] }
 0x7a2   : > { %v2345_v0 = vsel %vm687_vm1, %v2344_v46, 0.0 }
 0x7a3   : > { %2346 = vadd.xlane.f32.xlu0 %v2345_v0 }
 0x830   : > { %v2347_v47 = vpop.xlane.xlu0 %2346 }
 0x831   : > { %v2349_v48 = vmul.f32 0.03125, %v2347_v47 }
 0x833   : > { %v2350_v49 = vsub.f32 %v2344_v46, %v2349_v48 }
 0x835   : > { %v2351_v50 = vmul.f32 %v2350_v49, %v2350_v49 }
 0x837   : > { %v2352_v51 = vsel %vm687_vm1, %v2351_v50, 0.0 }
 0x838   : > { %2353 = vadd.xlane.f32.xlu1 %v2352_v51 }
 0x8c5   : > { %v2354_v52 = vpop.xlane.xlu1 %2353 }
 0x8c6   : > { %v2355_v53 = vmul.f32 0.03125, %v2354_v52 }
 0x8c8   : > { %v2356_v54 = vadd.f32 1e-05, %v2355_v53 }
 0x8ca   : > { %3005 = vrsqrt.f32 %v2356_v54 }
 0x8d4   : > { %v3006_v55 = vpop.eup %3005 }
 0x8d5   : > { %v2358_v56 = vmul.f32 %v3006_v55, %v2350_v49 }
 0x8d7   : > { %v2366_v58 = vmul.f32 %v2630_v16, %v2358_v56 }
 0x8d9   : > { %v2374_v59 = vadd.f32 %v2631_v57, %v2366_v58 }
 0x8db   : > { %2375 = vst.msk [vmem:[%s674_s17] sm:$0xff] %vm687_vm1, %v2374_v59 }
 0x8dc   : > { %3306 = shalt.err (!%p3303_p13)
}
 0x8dd   : > { %s3307_s8 = scalar_lea.hbm %s4054_s18, 128  ;;  %s3311_s30 = scalar_lea.hbm %s4199_s22, 256 }
 0x8de   : > { %p3308_p5 = scmp.ne.s32.totalorder %s4054_s18, %s3307_s8  ;;  %p3312_p3 = scmp.lt.u32.totalorder %s4054_s18, %s4199_s22 }
 0x8df   : > { %p3313_p2 = scmp.lt.u32.totalorder %s3311_s30, %s3307_s8  ;;  %p3315_p8 = scmp.lt.u32.totalorder %s3307_s8, %s4054_s18 }
 0x8e0   : > { %p3309_p9 = pnand %p3308_p5, %p4200_p4 }
 0x8e1   : > { %p3314_p0 = por %p3313_p2, %p3312_p3 }
 0x8e2   : > { %p3310_p11 = pneg %p3309_p9 }
 0x8e3   : > { %p3316_p7 = por %p3315_p8, %p3314_p0 }
 0x8e5   : > { %p3317_p12 = pnand %p3316_p7, %p3310_p11 }
 0x8e7   : > { %3320 = shalt.err (!%p3317_p12)
}
 0x8e8   : > { %2878 = dma.vmem_to_hbm [thread:$0]  (%p4200_p4), %s4056_s16, 128, %s4054_s18, %s2377_s9  }
 0x8e9 PF: > { %s4201_s13 = sld [smem:[#allocation28_spill]]  ;;  %s4202_s14 = sld [smem:[#allocation34_spill]] }
 0x8ea   : > { %s4203_s6 = sld [smem:[#allocation29_spill]] }
 0x8ef   : > { %s2402_s25 = sand.u32 1, %s4201_s13   ;;  %p4204_p10 = scmp.ne.s32.totalorder %s4202_s14, 0 }
 0x8f0   : > { %p4205_p1 = scmp.ge.s32.totalorder %s4203_s6, 2  ;;  %s2403_s17 = scalar_lea.sflag [#allocation5], %s2402_s25 }
 0x8f2   : > { %p2913_p6 = pnand %p4205_p1, %p4204_p10 }
 0x8f4   : > { %3362 = dma.done.wait (!%p2913_p6), %s2403_s17, 128  }
 0x8f5   : > { %3364 = vsyncadd (!%p2913_p6), %s2403_s17, 4294967168  ;;  %s4206_s21 = sld [smem:[#allocation31_spill]]  ;;  %s4207_s15 = sld [smem:[#allocation32_spill]] }
 0x8f6   : > { %s4208_s18 = smov %s3371_s19  ;;  %s4209_s19 = smov %s3375_s20 }
 0x8fb   : > { %p35_p13 = scmp.ge.s32.totalorder %s4206_s21, 4   ;;  %s4210_s20 = smov %s4207_s15 }
 0x8fd   :  { %37 = sbr.rel (!%p35_p13) target bundleno = 23 (0x17), region = 177 }
 0x904   :  { %2408 = vsyncpa [#allocation4], 1 }
 0x905   :  { %2410 = vsyncpa [#allocation4 + $0x1], 1 }
 0x906   :  { %2411 = vsyncpa [#allocation7], 1 }
 0x907   :  { %2413 = vsyncpa [#allocation7 + $0x1], 1 }
 0x908   :  { %2414 = vsyncpa [#allocation10], 1 }
 0x909   :  { %2415 = vsyncpa [#allocation13], 1 }
 0x90a   :  { %2416 = vsyncpa [#allocation16], 1 }
 0x90b   :  { %2417 = vsyncpa [#allocation19], 1 }
 0x90c   :  { %2418 = vsyncpa [#allocation5], 1 }
 0x90d   :  { %2420 = vsyncpa [#allocation5 + $0x1], 1 }

</bundles_post_ra>
